<compile_context>
chip_gen: v7x
topology: tpu7x:2x2x1
jax: 0.10.0
libtpu: 0.0.40
codegen_flags: <defaults>
</compile_context>

<pallas_src>
import numpy as np
import jax
import jax.numpy as jnp
from jax import lax
from jax.experimental import pallas as pl
from jax.experimental.pallas import tpu as pltpu

KSIZE = 4
STRIDE = 2
PAD = 1


# ------------------------------ Pallas kernel --------------------------------
def _fused_projection_kernel(x_ref,
                             g1_ref, t1_ref, b1_ref,
                             g2_ref, t2_ref, b2_ref,
                             g3_ref, t3_ref, b3_ref,
                             e_ref, q_ref,
                             out_ref,
                             x2d_ref):
    B, C0, H, W = x_ref.shape

    # NCHW -> 2D (B*H, C0*W) (channel-major columns), assembled in VMEM scratch.
    for b in range(B):
        for c in range(C0):
            x2d_ref[b * H:(b + 1) * H, c * W:(c + 1) * W] = x_ref[b, c]
    act = x2d_ref[...]

    # One Conv2d(k=4, s=2, p=1) + bias + ReLU layer: 8 small MXU matmuls.
    def conv_relu(a, g_ref, t_ref, brow_ref):
        acc = None
        for kh in range(g_ref.shape[0]):
            z = jnp.dot(g_ref[kh], a, preferred_element_type=jnp.float32)
            p = jnp.dot(z, t_ref[kh], preferred_element_type=jnp.float32)
            acc = p if acc is None else acc + p
        return jnp.maximum(acc + brow_ref[...], 0.0)

    act = conv_relu(act, g1_ref, t1_ref, b1_ref)   # (B*8, 8*12)
    act = conv_relu(act, g2_ref, t2_ref, b2_ref)   # (B*4, 4*24)
    act = conv_relu(act, g3_ref, t3_ref, b3_ref)   # (B*2, 2*48)

    # NHWC -> PyTorch-NCHW flatten via constant permutation matmuls.
    out = None
    for i in range(e_ref.shape[0]):
        part = jnp.dot(jnp.dot(e_ref[i], act, preferred_element_type=jnp.float32),
                       q_ref[i], preferred_element_type=jnp.float32)
        out = part if out is None else out + part
    out_ref[...] = out.astype(out_ref.dtype)


# --------------------- host-side (one-time) parameter prep -------------------
def _row_select(batch, h_in, h_out, kh):
    """0/1 matrix selecting padded input row (2*oh + kh - PAD) per (b, oh)."""
    g = np.zeros((batch * h_out, batch * h_in), np.float32)
    for b in range(batch):
        for oh in range(h_out):
            r = STRIDE * oh + kh - PAD
            if 0 <= r < h_in:
                g[b * h_out + oh, b * h_in + r] = 1.0
    return g


def _weight_scatter(w_oihw, w_in, w_out, kh, channel_major):
    """Block-banded weight matrix for tap row kh: (w_in*cin, w_out*cout)."""
    cout, cin, _, kwn = w_oihw.shape
    t = np.zeros((w_in * cin, w_out * cout), np.float32)
    for kw in range(kwn):
        for ow in range(w_out):
            s = STRIDE * ow + kw - PAD
            if 0 <= s < w_in:
                for c in range(cin):
                    row = c * w_in + s if channel_major else s * cin + c
                    t[row, ow * cout:(ow + 1) * cout] = w_oihw[:, c, kh, kw]
    return t


def prepare_params(params, batch, input_hw):
    """Turn PyTorch-layout (Cout,Cin,KH,KW) conv params into the constant
    matrices consumed by the fused kernel.  Runs once, on the host."""
    h, w = input_hw
    prep = []
    cout = None
    for idx, (w_oihw, bias) in enumerate(params):
        wnp = np.asarray(w_oihw, np.float32)
        bnp = np.asarray(bias, np.float32)
        cout = wnp.shape[0]
        assert h % 2 == 0 and w % 2 == 0
        oh, ow = h // 2, w // 2
        g = np.stack([_row_select(batch, h, oh, kh) for kh in range(KSIZE)])
        t = np.stack([_weight_scatter(wnp, w, ow, kh, channel_major=(idx == 0))
                      for kh in range(KSIZE)])
        brow = np.tile(bnp, ow)[None, :]                    # (1, ow*cout)
        prep += [jnp.asarray(g), jnp.asarray(t), jnp.asarray(brow)]
        h, w = oh, ow

    # Flatten permutation: out[b, c*h*w + i*w + j] = Y[b*h + i, j*cout + c]
    e = np.zeros((h, batch, batch * h), np.float32)
    q = np.zeros((h, w * cout, cout * h * w), np.float32)
    for i in range(h):
        for b in range(batch):
            e[i, b, b * h + i] = 1.0
        for j in range(w):
            for c in range(cout):
                q[i, j * cout + c, c * h * w + i * w + j] = 1.0
    prep += [jnp.asarray(e), jnp.asarray(q)]
    return tuple(prep)


# --------------------------------- forward -----------------------------------
def random_projection_forward(x_nchw, prep):
    (g1, t1, b1, g2, t2, b2, g3, t3, b3, e, q) = prep
    batch, c0, h, w = x_nchw.shape
    out_dim = q.shape[-1]
    vmem = pltpu.MemorySpace.VMEM
    return pl.pallas_call(
        _fused_projection_kernel,
        out_shape=jax.ShapeDtypeStruct((batch, out_dim), jnp.float32),
        in_specs=[pl.BlockSpec(memory_space=vmem) for _ in range(12)],
        out_specs=pl.BlockSpec(memory_space=vmem),
        scratch_shapes=[pltpu.VMEM((batch * h, c0 * w), jnp.float32)],
    )(x_nchw, g1, t1, b1, g2, t2, b2, g3, t3, b3, e, q)


random_projection_forward_jit = jax.jit(random_projection_forward)


# --------------------------- reference (for check) ----------------------------
def _reference_forward(x_nchw, params):
    x = x_nchw
    for (wgt, b) in params:
        x = lax.conv_general_dilated(
            x, wgt, window_strides=(STRIDE, STRIDE),
            padding=((PAD, PAD), (PAD, PAD)),
            dimension_numbers=("NCHW", "OIHW", "NCHW"))
        x = jnp.maximum(x + b.reshape(1, -1, 1, 1), 0.0)
    return x.reshape(x_nchw.shape[0], -1)


def _init_params(key, input_channels=3):
    """Deterministic conv parameters (same shapes as the PyTorch module)."""
    layer_dims = [(input_channels, 12), (12, 24), (24, 48)]
    params = []
    for (cin, cout) in layer_dims:
        key, k_w, k_b = jax.random.split(key, 3)
        fan_in = cin * KSIZE * KSIZE
        bound = 1.0 / float(np.sqrt(fan_in))
        wgt = jax.random.uniform(k_w, (cout, cin, KSIZE, KSIZE), jnp.float32,
                                 -bound, bound)
        b = jax.random.uniform(k_b, (cout,), jnp.float32, -bound, bound)
        params.append((wgt, b))
    return params


# ----------------------------------- main -------------------------------------
if __name__ == "__main__":
    key = jax.random.PRNGKey(0)
    key, kx = jax.random.split(key)

    batch, cin, hw = 2, 3, 16
    x = jax.random.normal(kx, (batch, cin, hw, hw), jnp.float32)
    params = _init_params(key, input_channels=cin)

    prep = prepare_params(params, batch=batch, input_hw=(hw, hw))

    out = random_projection_forward_jit(x, prep)
    out = jax.block_until_ready(out)

    # Expected flattened size: 48 * (16/8) * (16/8) = 192
    assert out.shape == (batch, 48 * (hw // 8) * (hw // 8)), out.shape

    ref = _reference_forward(x, params)
    max_err = float(jnp.max(jnp.abs(out - ref)))
    assert jnp.allclose(out, ref, atol=1e-3, rtol=1e-3), max_err

    print("KERNEL_OK")
</pallas_src>

<mosaic_0001>
module attributes {stable_mosaic.version = 11 : i64} {
  func.func @_fused_projection_kernel(%arg0: memref<2x3x16x16xf32, #tpu.memory_space<vmem>>, %arg1: memref<4x16x32xf32, #tpu.memory_space<vmem>>, %arg2: memref<4x48x96xf32, #tpu.memory_space<vmem>>, %arg3: memref<1x96xf32, #tpu.memory_space<vmem>>, %arg4: memref<4x8x16xf32, #tpu.memory_space<vmem>>, %arg5: memref<4x96x96xf32, #tpu.memory_space<vmem>>, %arg6: memref<1x96xf32, #tpu.memory_space<vmem>>, %arg7: memref<4x4x8xf32, #tpu.memory_space<vmem>>, %arg8: memref<4x96x96xf32, #tpu.memory_space<vmem>>, %arg9: memref<1x96xf32, #tpu.memory_space<vmem>>, %arg10: memref<2x2x4xf32, #tpu.memory_space<vmem>>, %arg11: memref<2x96x192xf32, #tpu.memory_space<vmem>>, %arg12: memref<2x192xf32, #tpu.memory_space<vmem>>, %arg13: memref<32x48xf32, #tpu.memory_space<vmem>>) attributes {dimension_semantics = [], scalar_prefetch = 0 : i64, scratch_operands = 1 : i64, tpu.core_type = #tpu.core_type<tc>} {
    %c0 = arith.constant 0 : index
    %c0_0 = arith.constant 0 : index
    %c0_1 = arith.constant 0 : index
    %c0_2 = arith.constant 0 : index
    %0 = vector.load %arg0[%c0, %c0_0, %c0_1, %c0_2] : memref<2x3x16x16xf32, #tpu.memory_space<vmem>>, vector<1x1x16x16xf32>
    %1 = vector.shape_cast %0 : vector<1x1x16x16xf32> to vector<16x16xf32>
    %c0_3 = arith.constant 0 : index
    %c0_4 = arith.constant 0 : index
    %2 = vector.load %arg13[%c0_3, %c0_4] : memref<32x48xf32, #tpu.memory_space<vmem>>, vector<16x16xf32>
    tpu.vector_store %arg13[%c0_3, %c0_4], %1 {strides = array<i32>} : memref<32x48xf32, #tpu.memory_space<vmem>>, vector<16x16xf32>,
    %c0_5 = arith.constant 0 : index
    %c1 = arith.constant 1 : index
    %c0_6 = arith.constant 0 : index
    %c0_7 = arith.constant 0 : index
    %3 = vector.load %arg0[%c0_5, %c1, %c0_6, %c0_7] : memref<2x3x16x16xf32, #tpu.memory_space<vmem>>, vector<1x1x16x16xf32>
    %4 = vector.shape_cast %3 : vector<1x1x16x16xf32> to vector<16x16xf32>
    %c0_8 = arith.constant 0 : index
    %c16 = arith.constant 16 : index
    %5 = vector.load %arg13[%c0_8, %c16] : memref<32x48xf32, #tpu.memory_space<vmem>>, vector<16x16xf32>
    tpu.vector_store %arg13[%c0_8, %c16], %4 {strides = array<i32>} : memref<32x48xf32, #tpu.memory_space<vmem>>, vector<16x16xf32>,
    %c0_9 = arith.constant 0 : index
    %c2 = arith.constant 2 : index
    %c0_10 = arith.constant 0 : index
    %c0_11 = arith.constant 0 : index
    %6 = vector.load %arg0[%c0_9, %c2, %c0_10, %c0_11] : memref<2x3x16x16xf32, #tpu.memory_space<vmem>>, vector<1x1x16x16xf32>
    %7 = vector.shape_cast %6 : vector<1x1x16x16xf32> to vector<16x16xf32>
    %c0_12 = arith.constant 0 : index
    %c32 = arith.constant 32 : index
    %8 = vector.load %arg13[%c0_12, %c32] : memref<32x48xf32, #tpu.memory_space<vmem>>, vector<16x16xf32>
    tpu.vector_store %arg13[%c0_12, %c32], %7 {strides = array<i32>} : memref<32x48xf32, #tpu.memory_space<vmem>>, vector<16x16xf32>,
    %c1_13 = arith.constant 1 : index
    %c0_14 = arith.constant 0 : index
    %c0_15 = arith.constant 0 : index
    %c0_16 = arith.constant 0 : index
    %9 = vector.load %arg0[%c1_13, %c0_14, %c0_15, %c0_16] : memref<2x3x16x16xf32, #tpu.memory_space<vmem>>, vector<1x1x16x16xf32>
    %10 = vector.shape_cast %9 : vector<1x1x16x16xf32> to vector<16x16xf32>
    %c16_17 = arith.constant 16 : index
    %c0_18 = arith.constant 0 : index
    %11 = vector.load %arg13[%c16_17, %c0_18] : memref<32x48xf32, #tpu.memory_space<vmem>>, vector<16x16xf32>
    tpu.vector_store %arg13[%c16_17, %c0_18], %10 {strides = array<i32>} : memref<32x48xf32, #tpu.memory_space<vmem>>, vector<16x16xf32>,
    %c1_19 = arith.constant 1 : index
    %c1_20 = arith.constant 1 : index
    %c0_21 = arith.constant 0 : index
    %c0_22 = arith.constant 0 : index
    %12 = vector.load %arg0[%c1_19, %c1_20, %c0_21, %c0_22] : memref<2x3x16x16xf32, #tpu.memory_space<vmem>>, vector<1x1x16x16xf32>
    %13 = vector.shape_cast %12 : vector<1x1x16x16xf32> to vector<16x16xf32>
    %c16_23 = arith.constant 16 : index
    %c16_24 = arith.constant 16 : index
    %14 = vector.load %arg13[%c16_23, %c16_24] : memref<32x48xf32, #tpu.memory_space<vmem>>, vector<16x16xf32>
    tpu.vector_store %arg13[%c16_23, %c16_24], %13 {strides = array<i32>} : memref<32x48xf32, #tpu.memory_space<vmem>>, vector<16x16xf32>,
    %c1_25 = arith.constant 1 : index
    %c2_26 = arith.constant 2 : index
    %c0_27 = arith.constant 0 : index
    %c0_28 = arith.constant 0 : index
    %15 = vector.load %arg0[%c1_25, %c2_26, %c0_27, %c0_28] : memref<2x3x16x16xf32, #tpu.memory_space<vmem>>, vector<1x1x16x16xf32>
    %16 = vector.shape_cast %15 : vector<1x1x16x16xf32> to vector<16x16xf32>
    %c16_29 = arith.constant 16 : index
    %c32_30 = arith.constant 32 : index
    %17 = vector.load %arg13[%c16_29, %c32_30] : memref<32x48xf32, #tpu.memory_space<vmem>>, vector<16x16xf32>
    tpu.vector_store %arg13[%c16_29, %c32_30], %16 {strides = array<i32>} : memref<32x48xf32, #tpu.memory_space<vmem>>, vector<16x16xf32>,
    %c0_31 = arith.constant 0 : index
    %c0_32 = arith.constant 0 : index
    %18 = vector.load %arg13[%c0_31, %c0_32] : memref<32x48xf32, #tpu.memory_space<vmem>>, vector<32x48xf32>
    %c0_33 = arith.constant 0 : index
    %c0_34 = arith.constant 0 : index
    %c0_35 = arith.constant 0 : index
    %19 = vector.load %arg1[%c0_33, %c0_34, %c0_35] : memref<4x16x32xf32, #tpu.memory_space<vmem>>, vector<1x16x32xf32>
    %20 = vector.shape_cast %19 : vector<1x16x32xf32> to vector<16x32xf32>
    %cst = arith.constant dense<0.000000e+00> : vector<16x48xf32>
    %21 = tpu.matmul %20, %18, %cst {dimension_numbers = #tpu.dot_dimension_numbers<[1], [0], [0], [1], [0, 0, 1, 1], [], []>} : vector<16x32xf32>, vector<32x48xf32>, vector<16x48xf32> -> vector<16x48xf32>
    %c0_36 = arith.constant 0 : index
    %c0_37 = arith.constant 0 : index
    %c0_38 = arith.constant 0 : index
    %22 = vector.load %arg2[%c0_36, %c0_37, %c0_38] : memref<4x48x96xf32, #tpu.memory_space<vmem>>, vector<1x48x96xf32>
    %23 = vector.shape_cast %22 : vector<1x48x96xf32> to vector<48x96xf32>
    %cst_39 = arith.constant dense<0.000000e+00> : vector<16x96xf32>
    %24 = tpu.matmul %21, %23, %cst_39 {dimension_numbers = #tpu.dot_dimension_numbers<[1], [0], [0], [1], [0, 0, 1, 1], [], []>} : vector<16x48xf32>, vector<48x96xf32>, vector<16x96xf32> -> vector<16x96xf32>
    %c1_40 = arith.constant 1 : index
    %c0_41 = arith.constant 0 : index
    %c0_42 = arith.constant 0 : index
    %25 = vector.load %arg1[%c1_40, %c0_41, %c0_42] : memref<4x16x32xf32, #tpu.memory_space<vmem>>, vector<1x16x32xf32>
    %26 = vector.shape_cast %25 : vector<1x16x32xf32> to vector<16x32xf32>
    %cst_43 = arith.constant dense<0.000000e+00> : vector<16x48xf32>
    %27 = tpu.matmul %26, %18, %cst_43 {dimension_numbers = #tpu.dot_dimension_numbers<[1], [0], [0], [1], [0, 0, 1, 1], [], []>} : vector<16x32xf32>, vector<32x48xf32>, vector<16x48xf32> -> vector<16x48xf32>
    %c1_44 = arith.constant 1 : index
    %c0_45 = arith.constant 0 : index
    %c0_46 = arith.constant 0 : index
    %28 = vector.load %arg2[%c1_44, %c0_45, %c0_46] : memref<4x48x96xf32, #tpu.memory_space<vmem>>, vector<1x48x96xf32>
    %29 = vector.shape_cast %28 : vector<1x48x96xf32> to vector<48x96xf32>
    %cst_47 = arith.constant dense<0.000000e+00> : vector<16x96xf32>
    %30 = tpu.matmul %27, %29, %cst_47 {dimension_numbers = #tpu.dot_dimension_numbers<[1], [0], [0], [1], [0, 0, 1, 1], [], []>} : vector<16x48xf32>, vector<48x96xf32>, vector<16x96xf32> -> vector<16x96xf32>
    %31 = arith.addf %24, %30 : vector<16x96xf32>
    %c2_48 = arith.constant 2 : index
    %c0_49 = arith.constant 0 : index
    %c0_50 = arith.constant 0 : index
    %32 = vector.load %arg1[%c2_48, %c0_49, %c0_50] : memref<4x16x32xf32, #tpu.memory_space<vmem>>, vector<1x16x32xf32>
    %33 = vector.shape_cast %32 : vector<1x16x32xf32> to vector<16x32xf32>
    %cst_51 = arith.constant dense<0.000000e+00> : vector<16x48xf32>
    %34 = tpu.matmul %33, %18, %cst_51 {dimension_numbers = #tpu.dot_dimension_numbers<[1], [0], [0], [1], [0, 0, 1, 1], [], []>} : vector<16x32xf32>, vector<32x48xf32>, vector<16x48xf32> -> vector<16x48xf32>
    %c2_52 = arith.constant 2 : index
    %c0_53 = arith.constant 0 : index
    %c0_54 = arith.constant 0 : index
    %35 = vector.load %arg2[%c2_52, %c0_53, %c0_54] : memref<4x48x96xf32, #tpu.memory_space<vmem>>, vector<1x48x96xf32>
    %36 = vector.shape_cast %35 : vector<1x48x96xf32> to vector<48x96xf32>
    %cst_55 = arith.constant dense<0.000000e+00> : vector<16x96xf32>
    %37 = tpu.matmul %34, %36, %cst_55 {dimension_numbers = #tpu.dot_dimension_numbers<[1], [0], [0], [1], [0, 0, 1, 1], [], []>} : vector<16x48xf32>, vector<48x96xf32>, vector<16x96xf32> -> vector<16x96xf32>
    %38 = arith.addf %31, %37 : vector<16x96xf32>
    %c3 = arith.constant 3 : index
    %c0_56 = arith.constant 0 : index
    %c0_57 = arith.constant 0 : index
    %39 = vector.load %arg1[%c3, %c0_56, %c0_57] : memref<4x16x32xf32, #tpu.memory_space<vmem>>, vector<1x16x32xf32>
    %40 = vector.shape_cast %39 : vector<1x16x32xf32> to vector<16x32xf32>
    %cst_58 = arith.constant dense<0.000000e+00> : vector<16x48xf32>
    %41 = tpu.matmul %40, %18, %cst_58 {dimension_numbers = #tpu.dot_dimension_numbers<[1], [0], [0], [1], [0, 0, 1, 1], [], []>} : vector<16x32xf32>, vector<32x48xf32>, vector<16x48xf32> -> vector<16x48xf32>
    %c3_59 = arith.constant 3 : index
    %c0_60 = arith.constant 0 : index
    %c0_61 = arith.constant 0 : index
    %42 = vector.load %arg2[%c3_59, %c0_60, %c0_61] : memref<4x48x96xf32, #tpu.memory_space<vmem>>, vector<1x48x96xf32>
    %43 = vector.shape_cast %42 : vector<1x48x96xf32> to vector<48x96xf32>
    %cst_62 = arith.constant dense<0.000000e+00> : vector<16x96xf32>
    %44 = tpu.matmul %41, %43, %cst_62 {dimension_numbers = #tpu.dot_dimension_numbers<[1], [0], [0], [1], [0, 0, 1, 1], [], []>} : vector<16x48xf32>, vector<48x96xf32>, vector<16x96xf32> -> vector<16x96xf32>
    %45 = arith.addf %38, %44 : vector<16x96xf32>
    %c0_63 = arith.constant 0 : index
    %c0_64 = arith.constant 0 : index
    %46 = vector.load %arg3[%c0_63, %c0_64] : memref<1x96xf32, #tpu.memory_space<vmem>>, vector<1x96xf32>
    %47 = vector.broadcast %46 : vector<1x96xf32> to vector<16x96xf32>
    %48 = arith.addf %45, %47 : vector<16x96xf32>
    %cst_65 = arith.constant 0.000000e+00 : f32
    %49 = vector.broadcast %cst_65 : f32 to vector<16x96xf32>
    %50 = arith.maximumf %48, %49 : vector<16x96xf32>
    %c0_66 = arith.constant 0 : index
    %c0_67 = arith.constant 0 : index
    %c0_68 = arith.constant 0 : index
    %51 = vector.load %arg4[%c0_66, %c0_67, %c0_68] : memref<4x8x16xf32, #tpu.memory_space<vmem>>, vector<1x8x16xf32>
    %52 = vector.shape_cast %51 : vector<1x8x16xf32> to vector<8x16xf32>
    %cst_69 = arith.constant dense<0.000000e+00> : vector<8x96xf32>
    %53 = tpu.matmul %52, %50, %cst_69 {dimension_numbers = #tpu.dot_dimension_numbers<[1], [0], [0], [1], [0, 0, 1, 1], [], []>} : vector<8x16xf32>, vector<16x96xf32>, vector<8x96xf32> -> vector<8x96xf32>
    %c0_70 = arith.constant 0 : index
    %c0_71 = arith.constant 0 : index
    %c0_72 = arith.constant 0 : index
    %54 = vector.load %arg5[%c0_70, %c0_71, %c0_72] : memref<4x96x96xf32, #tpu.memory_space<vmem>>, vector<1x96x96xf32>
    %55 = vector.shape_cast %54 : vector<1x96x96xf32> to vector<96x96xf32>
    %cst_73 = arith.constant dense<0.000000e+00> : vector<8x96xf32>
    %56 = tpu.matmul %53, %55, %cst_73 {dimension_numbers = #tpu.dot_dimension_numbers<[1], [0], [0], [1], [0, 0, 1, 1], [], []>} : vector<8x96xf32>, vector<96x96xf32>, vector<8x96xf32> -> vector<8x96xf32>
    %c1_74 = arith.constant 1 : index
    %c0_75 = arith.constant 0 : index
    %c0_76 = arith.constant 0 : index
    %57 = vector.load %arg4[%c1_74, %c0_75, %c0_76] : memref<4x8x16xf32, #tpu.memory_space<vmem>>, vector<1x8x16xf32>
    %58 = vector.shape_cast %57 : vector<1x8x16xf32> to vector<8x16xf32>
    %cst_77 = arith.constant dense<0.000000e+00> : vector<8x96xf32>
    %59 = tpu.matmul %58, %50, %cst_77 {dimension_numbers = #tpu.dot_dimension_numbers<[1], [0], [0], [1], [0, 0, 1, 1], [], []>} : vector<8x16xf32>, vector<16x96xf32>, vector<8x96xf32> -> vector<8x96xf32>
    %c1_78 = arith.constant 1 : index
    %c0_79 = arith.constant 0 : index
    %c0_80 = arith.constant 0 : index
    %60 = vector.load %arg5[%c1_78, %c0_79, %c0_80] : memref<4x96x96xf32, #tpu.memory_space<vmem>>, vector<1x96x96xf32>
    %61 = vector.shape_cast %60 : vector<1x96x96xf32> to vector<96x96xf32>
    %cst_81 = arith.constant dense<0.000000e+00> : vector<8x96xf32>
    %62 = tpu.matmul %59, %61, %cst_81 {dimension_numbers = #tpu.dot_dimension_numbers<[1], [0], [0], [1], [0, 0, 1, 1], [], []>} : vector<8x96xf32>, vector<96x96xf32>, vector<8x96xf32> -> vector<8x96xf32>
    %63 = arith.addf %56, %62 : vector<8x96xf32>
    %c2_82 = arith.constant 2 : index
    %c0_83 = arith.constant 0 : index
    %c0_84 = arith.constant 0 : index
    %64 = vector.load %arg4[%c2_82, %c0_83, %c0_84] : memref<4x8x16xf32, #tpu.memory_space<vmem>>, vector<1x8x16xf32>
    %65 = vector.shape_cast %64 : vector<1x8x16xf32> to vector<8x16xf32>
    %cst_85 = arith.constant dense<0.000000e+00> : vector<8x96xf32>
    %66 = tpu.matmul %65, %50, %cst_85 {dimension_numbers = #tpu.dot_dimension_numbers<[1], [0], [0], [1], [0, 0, 1, 1], [], []>} : vector<8x16xf32>, vector<16x96xf32>, vector<8x96xf32> -> vector<8x96xf32>
    %c2_86 = arith.constant 2 : index
    %c0_87 = arith.constant 0 : index
    %c0_88 = arith.constant 0 : index
    %67 = vector.load %arg5[%c2_86, %c0_87, %c0_88] : memref<4x96x96xf32, #tpu.memory_space<vmem>>, vector<1x96x96xf32>
    %68 = vector.shape_cast %67 : vector<1x96x96xf32> to vector<96x96xf32>
    %cst_89 = arith.constant dense<0.000000e+00> : vector<8x96xf32>
    %69 = tpu.matmul %66, %68, %cst_89 {dimension_numbers = #tpu.dot_dimension_numbers<[1], [0], [0], [1], [0, 0, 1, 1], [], []>} : vector<8x96xf32>, vector<96x96xf32>, vector<8x96xf32> -> vector<8x96xf32>
    %70 = arith.addf %63, %69 : vector<8x96xf32>
    %c3_90 = arith.constant 3 : index
    %c0_91 = arith.constant 0 : index
    %c0_92 = arith.constant 0 : index
    %71 = vector.load %arg4[%c3_90, %c0_91, %c0_92] : memref<4x8x16xf32, #tpu.memory_space<vmem>>, vector<1x8x16xf32>
    %72 = vector.shape_cast %71 : vector<1x8x16xf32> to vector<8x16xf32>
    %cst_93 = arith.constant dense<0.000000e+00> : vector<8x96xf32>
    %73 = tpu.matmul %72, %50, %cst_93 {dimension_numbers = #tpu.dot_dimension_numbers<[1], [0], [0], [1], [0, 0, 1, 1], [], []>} : vector<8x16xf32>, vector<16x96xf32>, vector<8x96xf32> -> vector<8x96xf32>
    %c3_94 = arith.constant 3 : index
    %c0_95 = arith.constant 0 : index
    %c0_96 = arith.constant 0 : index
    %74 = vector.load %arg5[%c3_94, %c0_95, %c0_96] : memref<4x96x96xf32, #tpu.memory_space<vmem>>, vector<1x96x96xf32>
    %75 = vector.shape_cast %74 : vector<1x96x96xf32> to vector<96x96xf32>
    %cst_97 = arith.constant dense<0.000000e+00> : vector<8x96xf32>
    %76 = tpu.matmul %73, %75, %cst_97 {dimension_numbers = #tpu.dot_dimension_numbers<[1], [0], [0], [1], [0, 0, 1, 1], [], []>} : vector<8x96xf32>, vector<96x96xf32>, vector<8x96xf32> -> vector<8x96xf32>
    %77 = arith.addf %70, %76 : vector<8x96xf32>
    %c0_98 = arith.constant 0 : index
    %c0_99 = arith.constant 0 : index
    %78 = vector.load %arg6[%c0_98, %c0_99] : memref<1x96xf32, #tpu.memory_space<vmem>>, vector<1x96xf32>
    %79 = vector.broadcast %78 : vector<1x96xf32> to vector<8x96xf32>
    %80 = arith.addf %77, %79 : vector<8x96xf32>
    %cst_100 = arith.constant 0.000000e+00 : f32
    %81 = vector.broadcast %cst_100 : f32 to vector<8x96xf32>
    %82 = arith.maximumf %80, %81 : vector<8x96xf32>
    %c0_101 = arith.constant 0 : index
    %c0_102 = arith.constant 0 : index
    %c0_103 = arith.constant 0 : index
    %83 = vector.load %arg7[%c0_101, %c0_102, %c0_103] : memref<4x4x8xf32, #tpu.memory_space<vmem>>, vector<1x4x8xf32>
    %84 = vector.shape_cast %83 : vector<1x4x8xf32> to vector<4x8xf32>
    %cst_104 = arith.constant dense<0.000000e+00> : vector<4x96xf32>
    %85 = tpu.matmul %84, %82, %cst_104 {dimension_numbers = #tpu.dot_dimension_numbers<[1], [0], [0], [1], [0, 0, 1, 1], [], []>} : vector<4x8xf32>, vector<8x96xf32>, vector<4x96xf32> -> vector<4x96xf32>
    %c0_105 = arith.constant 0 : index
    %c0_106 = arith.constant 0 : index
    %c0_107 = arith.constant 0 : index
    %86 = vector.load %arg8[%c0_105, %c0_106, %c0_107] : memref<4x96x96xf32, #tpu.memory_space<vmem>>, vector<1x96x96xf32>
    %87 = vector.shape_cast %86 : vector<1x96x96xf32> to vector<96x96xf32>
    %cst_108 = arith.constant dense<0.000000e+00> : vector<4x96xf32>
    %88 = tpu.matmul %85, %87, %cst_108 {dimension_numbers = #tpu.dot_dimension_numbers<[1], [0], [0], [1], [0, 0, 1, 1], [], []>} : vector<4x96xf32>, vector<96x96xf32>, vector<4x96xf32> -> vector<4x96xf32>
    %c1_109 = arith.constant 1 : index
    %c0_110 = arith.constant 0 : index
    %c0_111 = arith.constant 0 : index
    %89 = vector.load %arg7[%c1_109, %c0_110, %c0_111] : memref<4x4x8xf32, #tpu.memory_space<vmem>>, vector<1x4x8xf32>
    %90 = vector.shape_cast %89 : vector<1x4x8xf32> to vector<4x8xf32>
    %cst_112 = arith.constant dense<0.000000e+00> : vector<4x96xf32>
    %91 = tpu.matmul %90, %82, %cst_112 {dimension_numbers = #tpu.dot_dimension_numbers<[1], [0], [0], [1], [0, 0, 1, 1], [], []>} : vector<4x8xf32>, vector<8x96xf32>, vector<4x96xf32> -> vector<4x96xf32>
    %c1_113 = arith.constant 1 : index
    %c0_114 = arith.constant 0 : index
    %c0_115 = arith.constant 0 : index
    %92 = vector.load %arg8[%c1_113, %c0_114, %c0_115] : memref<4x96x96xf32, #tpu.memory_space<vmem>>, vector<1x96x96xf32>
    %93 = vector.shape_cast %92 : vector<1x96x96xf32> to vector<96x96xf32>
    %cst_116 = arith.constant dense<0.000000e+00> : vector<4x96xf32>
    %94 = tpu.matmul %91, %93, %cst_116 {dimension_numbers = #tpu.dot_dimension_numbers<[1], [0], [0], [1], [0, 0, 1, 1], [], []>} : vector<4x96xf32>, vector<96x96xf32>, vector<4x96xf32> -> vector<4x96xf32>
    %95 = arith.addf %88, %94 : vector<4x96xf32>
    %c2_117 = arith.constant 2 : index
    %c0_118 = arith.constant 0 : index
    %c0_119 = arith.constant 0 : index
    %96 = vector.load %arg7[%c2_117, %c0_118, %c0_119] : memref<4x4x8xf32, #tpu.memory_space<vmem>>, vector<1x4x8xf32>
    %97 = vector.shape_cast %96 : vector<1x4x8xf32> to vector<4x8xf32>
    %cst_120 = arith.constant dense<0.000000e+00> : vector<4x96xf32>
    %98 = tpu.matmul %97, %82, %cst_120 {dimension_numbers = #tpu.dot_dimension_numbers<[1], [0], [0], [1], [0, 0, 1, 1], [], []>} : vector<4x8xf32>, vector<8x96xf32>, vector<4x96xf32> -> vector<4x96xf32>
    %c2_121 = arith.constant 2 : index
    %c0_122 = arith.constant 0 : index
    %c0_123 = arith.constant 0 : index
    %99 = vector.load %arg8[%c2_121, %c0_122, %c0_123] : memref<4x96x96xf32, #tpu.memory_space<vmem>>, vector<1x96x96xf32>
    %100 = vector.shape_cast %99 : vector<1x96x96xf32> to vector<96x96xf32>
    %cst_124 = arith.constant dense<0.000000e+00> : vector<4x96xf32>
    %101 = tpu.matmul %98, %100, %cst_124 {dimension_numbers = #tpu.dot_dimension_numbers<[1], [0], [0], [1], [0, 0, 1, 1], [], []>} : vector<4x96xf32>, vector<96x96xf32>, vector<4x96xf32> -> vector<4x96xf32>
    %102 = arith.addf %95, %101 : vector<4x96xf32>
    %c3_125 = arith.constant 3 : index
    %c0_126 = arith.constant 0 : index
    %c0_127 = arith.constant 0 : index
    %103 = vector.load %arg7[%c3_125, %c0_126, %c0_127] : memref<4x4x8xf32, #tpu.memory_space<vmem>>, vector<1x4x8xf32>
    %104 = vector.shape_cast %103 : vector<1x4x8xf32> to vector<4x8xf32>
    %cst_128 = arith.constant dense<0.000000e+00> : vector<4x96xf32>
    %105 = tpu.matmul %104, %82, %cst_128 {dimension_numbers = #tpu.dot_dimension_numbers<[1], [0], [0], [1], [0, 0, 1, 1], [], []>} : vector<4x8xf32>, vector<8x96xf32>, vector<4x96xf32> -> vector<4x96xf32>
    %c3_129 = arith.constant 3 : index
    %c0_130 = arith.constant 0 : index
    %c0_131 = arith.constant 0 : index
    %106 = vector.load %arg8[%c3_129, %c0_130, %c0_131] : memref<4x96x96xf32, #tpu.memory_space<vmem>>, vector<1x96x96xf32>
    %107 = vector.shape_cast %106 : vector<1x96x96xf32> to vector<96x96xf32>
    %cst_132 = arith.constant dense<0.000000e+00> : vector<4x96xf32>
    %108 = tpu.matmul %105, %107, %cst_132 {dimension_numbers = #tpu.dot_dimension_numbers<[1], [0], [0], [1], [0, 0, 1, 1], [], []>} : vector<4x96xf32>, vector<96x96xf32>, vector<4x96xf32> -> vector<4x96xf32>
    %109 = arith.addf %102, %108 : vector<4x96xf32>
    %c0_133 = arith.constant 0 : index
    %c0_134 = arith.constant 0 : index
    %110 = vector.load %arg9[%c0_133, %c0_134] : memref<1x96xf32, #tpu.memory_space<vmem>>, vector<1x96xf32>
    %111 = vector.broadcast %110 : vector<1x96xf32> to vector<4x96xf32>
    %112 = arith.addf %109, %111 : vector<4x96xf32>
    %cst_135 = arith.constant 0.000000e+00 : f32
    %113 = vector.broadcast %cst_135 : f32 to vector<4x96xf32>
    %114 = arith.maximumf %112, %113 : vector<4x96xf32>
    %c0_136 = arith.constant 0 : index
    %c0_137 = arith.constant 0 : index
    %c0_138 = arith.constant 0 : index
    %115 = vector.load %arg10[%c0_136, %c0_137, %c0_138] : memref<2x2x4xf32, #tpu.memory_space<vmem>>, vector<1x2x4xf32>
    %116 = vector.shape_cast %115 : vector<1x2x4xf32> to vector<2x4xf32>
    %cst_139 = arith.constant dense<0.000000e+00> : vector<2x96xf32>
    %117 = tpu.matmul %116, %114, %cst_139 {dimension_numbers = #tpu.dot_dimension_numbers<[1], [0], [0], [1], [0, 0, 1, 1], [], []>} : vector<2x4xf32>, vector<4x96xf32>, vector<2x96xf32> -> vector<2x96xf32>
    %c0_140 = arith.constant 0 : index
    %c0_141 = arith.constant 0 : index
    %c0_142 = arith.constant 0 : index
    %118 = vector.load %arg11[%c0_140, %c0_141, %c0_142] : memref<2x96x192xf32, #tpu.memory_space<vmem>>, vector<1x96x192xf32>
    %119 = vector.shape_cast %118 : vector<1x96x192xf32> to vector<96x192xf32>
    %cst_143 = arith.constant dense<0.000000e+00> : vector<2x192xf32>
    %120 = tpu.matmul %117, %119, %cst_143 {dimension_numbers = #tpu.dot_dimension_numbers<[1], [0], [0], [1], [0, 0, 1, 1], [], []>} : vector<2x96xf32>, vector<96x192xf32>, vector<2x192xf32> -> vector<2x192xf32>
    %c1_144 = arith.constant 1 : index
    %c0_145 = arith.constant 0 : index
    %c0_146 = arith.constant 0 : index
    %121 = vector.load %arg10[%c1_144, %c0_145, %c0_146] : memref<2x2x4xf32, #tpu.memory_space<vmem>>, vector<1x2x4xf32>
    %122 = vector.shape_cast %121 : vector<1x2x4xf32> to vector<2x4xf32>
    %cst_147 = arith.constant dense<0.000000e+00> : vector<2x96xf32>
    %123 = tpu.matmul %122, %114, %cst_147 {dimension_numbers = #tpu.dot_dimension_numbers<[1], [0], [0], [1], [0, 0, 1, 1], [], []>} : vector<2x4xf32>, vector<4x96xf32>, vector<2x96xf32> -> vector<2x96xf32>
    %c1_148 = arith.constant 1 : index
    %c0_149 = arith.constant 0 : index
    %c0_150 = arith.constant 0 : index
    %124 = vector.load %arg11[%c1_148, %c0_149, %c0_150] : memref<2x96x192xf32, #tpu.memory_space<vmem>>, vector<1x96x192xf32>
    %125 = vector.shape_cast %124 : vector<1x96x192xf32> to vector<96x192xf32>
    %cst_151 = arith.constant dense<0.000000e+00> : vector<2x192xf32>
    %126 = tpu.matmul %123, %125, %cst_151 {dimension_numbers = #tpu.dot_dimension_numbers<[1], [0], [0], [1], [0, 0, 1, 1], [], []>} : vector<2x96xf32>, vector<96x192xf32>, vector<2x192xf32> -> vector<2x192xf32>
    %127 = arith.addf %120, %126 : vector<2x192xf32>
    %c0_152 = arith.constant 0 : index
    %c0_153 = arith.constant 0 : index
    %128 = vector.load %arg12[%c0_152, %c0_153] : memref<2x192xf32, #tpu.memory_space<vmem>>, vector<2x192xf32>
    tpu.vector_store %arg12[%c0_152, %c0_153], %127 {strides = array<i32>} : memref<2x192xf32, #tpu.memory_space<vmem>>, vector<2x192xf32>,
    return
  }
}

</mosaic_0001>

<bundles_post_ra>
// kernel: random_projection_forward.1
= control target key start
LH: loop header
LB: loop body
LE: loop exit
PB: predicated region body
PF: predicated region fallthrough
CT: control target
= control target key end

     0   :  { %17 = vsyncpa [#allocation4], 0  ;;  %s4097_s0 = inlined_call_operand.hbm [shape: f32[2,3,16,16], index: 0, kind: input, shape index: {}]   ;;  %s4098_s1 = inlined_call_operand.hbm [shape: f32[4,16,32], index: 1, kind: input, shape index: {}]   ;;  %s4099_s2 = inlined_call_operand.hbm [shape: f32[4,48,96], index: 2, kind: input, shape index: {}]   ;;  %s4100_s3 = inlined_call_operand.vmem [shape: f32[1,96], index: 3, kind: input, shape index: {}]   ;;  %s4101_s4 = inlined_call_operand.hbm [shape: f32[4,8,16], index: 4, kind: input, shape index: {}]   ;;  %s4102_s5 = inlined_call_operand.hbm [shape: f32[4,96,96], index: 5, kind: input, shape index: {}]   ;;  %s4103_s6 = inlined_call_operand.vmem [shape: f32[1,96], index: 6, kind: input, shape index: {}]   ;;  %s4104_s7 = inlined_call_operand.vmem [shape: f32[4,4,8], index: 7, kind: input, shape index: {}]   ;;  %s4105_s8 = inlined_call_operand.hbm [shape: f32[4,96,96], index: 8, kind: input, shape index: {}]   ;;  %s4106_s9 = inlined_call_operand.vmem [shape: f32[1,96], index: 9, kind: input, shape index: {}]   ;;  %s4107_s10 = inlined_call_operand.vmem [shape: f32[2,2,4], index: 10, kind: input, shape index: {}]   ;;  %s4108_s11 = inlined_call_operand.hbm [shape: f32[2,96,192], index: 11, kind: input, shape index: {}]   ;;  %s4109_s12 = inlined_call_operand.hbm [shape: f32[2,192], index: 12, kind: output, shape index: {}]  }
   0x1   :  { %18 = vsyncpa [#allocation7], 0 }
   0x2   :  { %19 = vsyncpa [#allocation10], 0 }
   0x3   :  { %20 = vsyncpa [#allocation13], 0 }
   0x4   :  { %21 = vsyncpa [#allocation5], 0  ;;  %s3702_s21 = smov [#allocation6]   ;;  %s3703_s23 = smov [#allocation9]  }
   0x5   :  { %s39_s22 = sshll.u32 %s3702_s21, 4  ;;  %s65_s24 = sshll.u32 %s3703_s23, 4  ;;  %s40_s22 = int_to_ptr.vmem [resolvable:$true] %s39_s22  ;;  %s3784_s24 = int_to_ptr.vmem [resolvable:$true] %s65_s24 }
   0x6   :  { %s3516_s27 = scalar_lea.hbm %s4098_s1, 1024 }
   0x7   :  { %p3517_p0 = scmp.ne.s32.totalorder %s4098_s1, %s3516_s27  ;;  %p3520_p1 = scmp.lt.u32.totalorder %s3516_s27, %s4098_s1 }
   0x9   :  { %p3522_p2 = pnand %p3520_p1, %p3517_p0 }
   0xb   :  { %3525 = shalt.err (!%p3522_p2)
}
   0xc   :  { %s3526_s14 = scalar_lea.vmem %s40_s22, 1024  ;;  %p3531_p4 = scmp.lt.s32.totalorder %s40_s22, %s40_s22 }
   0xd   :  { %p3527_p3 = scmp.ne.s32.totalorder %s40_s22, %s3526_s14  ;;  %p3532_p5 = scmp.lt.s32.totalorder %s3526_s14, %s3526_s14 }
   0xf   :  { %p3533_p6 = por %p3532_p5, %p3531_p4 }
  0x11   :  { %p3534_p7 = pnand %p3533_p6, %p3527_p3 }
  0x13   :  { %3537 = shalt.err (!%p3534_p7)
}
  0x14   :  { %s3704_s15 = smov 128   ;;  %s3705_s16 = smov 8  }
  0x15   :  { %45 = dma.hbm_to_vmem [thread:$0]  %s4098_s1, 1024, %s40_s22, [#allocation7], %s3704_s15, %s3704_s15, %s3705_s16  }
  0x16   :  { %s3538_s21 = scalar_lea.hbm %s4101_s4, 512 }
  0x17   :  { %p3539_p8 = scmp.ne.s32.totalorder %s4101_s4, %s3538_s21  ;;  %p3542_p9 = scmp.lt.u32.totalorder %s3538_s21, %s4101_s4 }
  0x19   :  { %p3544_p10 = pnand %p3542_p9, %p3539_p8 }
  0x1b   :  { %3547 = shalt.err (!%p3544_p10)
}
  0x1c   :  { %s3548_s28 = scalar_lea.vmem %s3784_s24, 512  ;;  %p3553_p12 = scmp.lt.s32.totalorder %s3784_s24, %s3784_s24 }
  0x1d   :  { %p3549_p11 = scmp.ne.s32.totalorder %s3784_s24, %s3548_s28  ;;  %p3554_p13 = scmp.lt.s32.totalorder %s3548_s28, %s3548_s28 }
  0x1f   :  { %p3555_p0 = por %p3554_p13, %p3553_p12 }
  0x21   :  { %p3556_p1 = pnand %p3555_p0, %p3549_p11 }
  0x23   :  { %3559 = shalt.err (!%p3556_p1)
}
  0x24   :  { %71 = dma.hbm_to_vmem [thread:$0]  %s4101_s4, 512, %s3784_s24, [#allocation10], %s3704_s15, %s3704_s15, %s3705_s16  }
  0x25   :  { %s3706_s29 = smov [#allocation12]   ;;  %s3707_s13 = smov [#allocation3]  }
  0x26   :  { %s93_s30 = sshll.u32 %s3706_s29, 4  ;;  %s27_s14 = sshll.u32 %s3707_s13, 4  ;;  %s94_s30 = int_to_ptr.vmem [resolvable:$true] %s93_s30  ;;  %s3821_s14 = int_to_ptr.vmem [resolvable:$true] %s27_s14 }
  0x27   :  { %s3560_s19 = scalar_lea.hbm %s4105_s8, 6144 }
  0x28   :  { %p3561_p2 = scmp.ne.s32.totalorder %s4105_s8, %s3560_s19  ;;  %p3564_p3 = scmp.lt.u32.totalorder %s3560_s19, %s4105_s8 }
  0x2a   :  { %p3566_p4 = pnand %p3564_p3, %p3561_p2 }
  0x2c   :  { %3569 = shalt.err (!%p3566_p4)
}
  0x2d   :  { %s3570_s4 = scalar_lea.vmem %s94_s30, 6144  ;;  %p3575_p6 = scmp.lt.s32.totalorder %s94_s30, %s94_s30 }
  0x2e   :  { %p3571_p5 = scmp.ne.s32.totalorder %s94_s30, %s3570_s4  ;;  %p3576_p7 = scmp.lt.s32.totalorder %s3570_s4, %s3570_s4 }
  0x30   :  { %p3577_p8 = por %p3576_p7, %p3575_p6 }
  0x32   :  { %p3578_p9 = pnand %p3577_p8, %p3571_p5 }
  0x34   :  { %3581 = shalt.err (!%p3578_p9)
}
  0x35   :  { %99 = dma.hbm_to_vmem [thread:$0]  %s4105_s8, 6144, %s94_s30, [#allocation13], %s3704_s15, %s3704_s15, %s3705_s16  }
  0x36   :  { %s3582_s1 = scalar_lea.hbm %s4097_s0, 1536 }
  0x37   :  { %p3583_p10 = scmp.ne.s32.totalorder %s4097_s0, %s3582_s1  ;;  %p3586_p11 = scmp.lt.u32.totalorder %s3582_s1, %s4097_s0 }
  0x39   :  { %p3588_p12 = pnand %p3586_p11, %p3583_p10 }
  0x3b   :  { %3591 = shalt.err (!%p3588_p12)
}
  0x3c   :  { %s3592_s18 = scalar_lea.vmem %s3821_s14, 1536  ;;  %p3597_p0 = scmp.lt.s32.totalorder %s3821_s14, %s3821_s14 }
  0x3d   :  { %p3593_p13 = scmp.ne.s32.totalorder %s3821_s14, %s3592_s18  ;;  %p3598_p1 = scmp.lt.s32.totalorder %s3592_s18, %s3592_s18 }
  0x3f   :  { %p3599_p2 = por %p3598_p1, %p3597_p0 }
  0x41   :  { %p3600_p3 = pnand %p3599_p2, %p3593_p13 }
  0x43   :  { %3603 = shalt.err (!%p3600_p3)
}
  0x44   :  { %33 = dma.hbm_to_vmem [thread:$0]  %s4097_s0, 1536, %s3821_s14, [#allocation4], %s3704_s15, %s3704_s15, %s3705_s16  }
  0x45   :  { %s3708_s19 = smov [#allocation8]   ;;  %s3709_s21 = smov [#allocation11]  }
  0x46   :  { %s51_s20 = sshll.u32 %s3708_s19, 4  ;;  %s77_s23 = sshll.u32 %s3709_s21, 4  ;;  %s52_s20 = int_to_ptr.vmem [resolvable:$true] %s51_s20  ;;  %s3858_s23 = int_to_ptr.vmem [resolvable:$true] %s77_s23 }
  0x47   :  { %s3604_s24 = scalar_lea.hbm %s4099_s2, 3072 }
  0x48   :  { %p3605_p4 = scmp.ne.s32.totalorder %s4099_s2, %s3604_s24  ;;  %p3608_p5 = scmp.lt.u32.totalorder %s3604_s24, %s4099_s2 }
  0x4a   :  { %p3610_p6 = pnand %p3608_p5, %p3605_p4 }
  0x4c   :  { %3613 = shalt.err (!%p3610_p6)
}
  0x4d   :  { %s3614_s0 = scalar_lea.vmem %s52_s20, 3072  ;;  %p3619_p8 = scmp.lt.s32.totalorder %s52_s20, %s52_s20 }
  0x4e   :  { %p3615_p7 = scmp.ne.s32.totalorder %s52_s20, %s3614_s0  ;;  %p3620_p9 = scmp.lt.s32.totalorder %s3614_s0, %s3614_s0 }
  0x50   :  { %p3621_p10 = por %p3620_p9, %p3619_p8 }
  0x52   :  { %p3622_p11 = pnand %p3621_p10, %p3615_p7 }
  0x54   :  { %3625 = shalt.err (!%p3622_p11)
}
  0x55   :  { %57 = dma.hbm_to_vmem [thread:$0]  %s4099_s2, 3072, %s52_s20, [#allocation7], %s3704_s15, %s3704_s15, %s3705_s16  }
  0x56   :  { %s3626_s17 = scalar_lea.hbm %s4102_s5, 6144 }
  0x57   :  { %p3627_p12 = scmp.ne.s32.totalorder %s4102_s5, %s3626_s17  ;;  %p3630_p13 = scmp.lt.u32.totalorder %s3626_s17, %s4102_s5 }
  0x59   :  { %p3632_p0 = pnand %p3630_p13, %p3627_p12 }
  0x5b   :  { %3635 = shalt.err (!%p3632_p0)
}
  0x5c   :  { %s3636_s21 = scalar_lea.vmem %s3858_s23, 6144  ;;  %p3641_p2 = scmp.lt.s32.totalorder %s3858_s23, %s3858_s23 }
  0x5d   :  { %p3637_p1 = scmp.ne.s32.totalorder %s3858_s23, %s3636_s21  ;;  %p3642_p3 = scmp.lt.s32.totalorder %s3636_s21, %s3636_s21 }
  0x5f   :  { %p3643_p4 = por %p3642_p3, %p3641_p2 }
  0x61   :  { %p3644_p5 = pnand %p3643_p4, %p3637_p1 }
  0x63   :  { %3647 = shalt.err (!%p3644_p5)
}
  0x64   :  { %83 = dma.hbm_to_vmem [thread:$0]  %s4102_s5, 6144, %s3858_s23, [#allocation10], %s3704_s15, %s3704_s15, %s3705_s16  }
  0x65   :  { %s3710_s25 = smov [#allocation14]   ;;  %s3648_s27 = scalar_lea.hbm %s4108_s11, 6144 }
  0x66   :  { %s109_s4 = sshll.u32 %s3710_s25, 4  ;;  %p3649_p6 = scmp.ne.s32.totalorder %s4108_s11, %s3648_s27  ;;  %s110_s4 = int_to_ptr.vmem [resolvable:$true] %s109_s4 }
  0x67   :  { %p3652_p7 = scmp.lt.u32.totalorder %s3648_s27, %s4108_s11 }
  0x69   :  { %p3654_p8 = pnand %p3652_p7, %p3649_p6 }
  0x6b   :  { %3657 = shalt.err (!%p3654_p8)
}
  0x6c   :  { %s3658_s22 = scalar_lea.vmem %s110_s4, 6144  ;;  %p3663_p10 = scmp.lt.s32.totalorder %s110_s4, %s110_s4 }
  0x6d   :  { %p3659_p9 = scmp.ne.s32.totalorder %s110_s4, %s3658_s22  ;;  %p3664_p11 = scmp.lt.s32.totalorder %s3658_s22, %s3658_s22 }
  0x6f   :  { %p3665_p12 = por %p3664_p11, %p3663_p10 }
  0x71   :  { %p3666_p13 = pnand %p3665_p12, %p3659_p9 }
  0x73   :  { %3669 = shalt.err (!%p3666_p13)
}
  0x74   :  { %s3711_s5 = smov 256   ;;  %s3712_s15 = smov 16  }
  0x75   :  { %115 = dma.hbm_to_vmem [thread:$0]  %s4108_s11, 6144, %s110_s4, [#allocation13], %s3711_s5, %s3711_s5, %s3712_s15  }
  0x76   :  { %3692 = dma.done.wait [#allocation4], 1536  }
  0x77   :  { %3693 = vsyncadd [#allocation4], 4294965760 }
  0x78   :  { %3694 = dma.done.wait [#allocation7], 4096  }
  0x79   :  { %3695 = vsyncadd [#allocation7], 4294963200 }
  0x7a   :  { %3696 = dma.done.wait [#allocation10], 6656  }
  0x7b   :  { %3697 = vsyncadd [#allocation10], 4294960640 }
  0x7c   :  { %3698 = dma.done.wait [#allocation13], 12288  }
  0x7d   :  { %3699 = vsyncadd [#allocation13], 4294955008  ;;  %v157_v0 = vld [vmem:[#allocation3 + $0x20] sm:$0xff]  ;;  %v143_v1 = vld [vmem:[#allocation3 + $0x10] sm:$0xff]  ;;  %vm139_vm0 = vcmask 130048   ;;  %s3713_s29 = smov 32  }
  0x7e   :  { %161 = vrot.lane.b32.xlu1 %v157_v0, %s3713_s29  ;;  %147 = vrot.lane.b32.xlu0 %v143_v1, %s3712_s15  ;;  %v158_v2 = vld [vmem:[#allocation3 + $0x28] sm:$0xff]  ;;  %v144_v3 = vld [vmem:[#allocation3 + $0x18] sm:$0xff]  ;;  %v137_v4 = vld [vmem:[#allocation3] sm:$0xff]  ;;  %vm207_vm1 = vcmask 261120   ;;  %vm153_vm2 = vcmask 261248   ;;  %vm167_vm3 = vcmask 392448  }
  0x7f   :  { %140 = vst.msk [vmem:[#allocation2] sm:$0xff] %vm139_vm0, %v137_v4  ;;  %v138_v5 = vld [vmem:[#allocation3 + $0x8] sm:$0xff]  ;;  %v172_v6 = vld [vmem:[#allocation3 + $0x38] sm:$0xff]  ;;  %v171_v7 = vld [vmem:[#allocation3 + $0x30] sm:$0xff]  ;;  %vm386_vm4 = vcmask 392192   ;;  %vm3715_vm5 = vmmov 0  }
  0x80   :  { %141 = vst.msk [vmem:[#allocation2 + $0x8] sm:$0xff] %vm139_vm0, %v138_v5  ;;  %174 = vst.msk [vmem:[#allocation2 + $0x18] sm:$0xff] %vm139_vm0, %v172_v6  ;;  %v177_v8 = vld [vmem:[#allocation3 + $0x48] sm:$0xff]  ;;  %v176_v9 = vld [vmem:[#allocation3 + $0x40] sm:$0xff]  ;;  %vm1082_vm6 = vcmask 785408   ;;  %vm1563_vm7 = vcmask 64512  }
  0x81   :  { %173 = vst.msk [vmem:[#allocation2 + $0x10] sm:$0xff] %vm139_vm0, %v171_v7  ;;  %v190_v10 = vld [vmem:[#allocation3 + $0x58] sm:$0xff]  ;;  %v189_v11 = vld [vmem:[#allocation3 + $0x50] sm:$0xff]  ;;  %v205_v13 = vld [vmem:[#allocation6] sm:$0xff]  ;;  %vm2221_vm8 = vcmask 1043456   ;;  %vm2217_vm9 = vcmask 31744  }
  0x82   :  { %163 = vrot.lane.b32.xlu1 %v158_v2, %s3713_s29  ;;  %149 = vrot.lane.b32.xlu0 %v144_v3, %s3712_s15  ;;  %v296_v12 = vld [vmem:[#allocation6 + $0x10] sm:$0xff]  ;;  %v381_v26 = vld [vmem:[#allocation8 + $0x38] sm:$0xff]  ;;  %v382_v31 = vld [vmem:[#allocation8 + $0x40] sm:$0xff]  ;;  %vm2578_vm10 = vcmask 1041408   ;;  %vm2579_vm11 = vcmask 519170  }
  0x83   :  { %2848 = vmatprep.mubr.msk.f32.mxu1 %vm207_vm1, %v296_v12  ;;  %2837 = vmatprep.mubr.msk.f32.mxu0 %vm207_vm1, %v205_v13  ;;  %v380_v25 = vld [vmem:[#allocation8 + $0x30] sm:$0xff]  ;;  %v383_v32 = vld [vmem:[#allocation8 + $0x48] sm:$0xff]  ;;  %v297_v33 = vld [vmem:[#allocation6 + $0x18] sm:$0xff] }
  0x84   :  { %v3223_v30 = vpack.c.bf16 %v381_v26, %v380_v25  ;;  %v206_v34 = vld [vmem:[#allocation6 + $0x8] sm:$0xff]  ;;  %v550_v35 = vld [vmem:[#allocation6 + $0x20] sm:$0xff]  ;;  %v3227_v36 = vpack.c.bf16 %v383_v32, %v382_v31  ;;  %v384_v37 = vld [vmem:[#allocation8 + $0x50] sm:$0xff] }
  0x85   :  { %v385_v38 = vld [vmem:[#allocation8 + $0x58] sm:$0xff]  ;;  %v551_v40 = vld [vmem:[#allocation6 + $0x28] sm:$0xff]  ;;  %v724_v41 = vld [vmem:[#allocation6 + $0x30] sm:$0xff] }
  0x86   :  { %182 = vrot.lane.b32.xlu1 %v177_v8, %s3712_s15  ;;  %180 = vrot.lane.b32.xlu0 %v176_v9, %s3712_s15  ;;  %v3231_v39 = vpack.c.bf16 %v385_v38, %v384_v37  ;;  %v725_v42 = vld [vmem:[#allocation6 + $0x38] sm:$0xff]  ;;  %v289_v43 = vld [vmem:[#allocation8] sm:$0xff]  ;;  %v290_v44 = vld [vmem:[#allocation8 + $0x8] sm:$0xff] }
  0x87   :  { %v3235_v45 = vpack.c.bf16 %v290_v44, %v289_v43  ;;  %v291_v46 = vld [vmem:[#allocation8 + $0x10] sm:$0xff]  ;;  %v292_v47 = vld [vmem:[#allocation8 + $0x18] sm:$0xff]  ;;  %v293_v53 = vld [vmem:[#allocation8 + $0x20] sm:$0xff] }
  0x88   :  { %v3239_v51 = vpack.c.bf16 %v292_v47, %v291_v46  ;;  %v294_v54 = vld [vmem:[#allocation8 + $0x28] sm:$0xff]  ;;  %v634_v56 = vld [vmem:[#allocation8 + $0x60] sm:$0xff]  ;;  %v636_v61 = vld [vmem:[#allocation8 + $0x70] sm:$0xff] }
  0x89   :  { %v3243_v55 = vpack.c.bf16 %v294_v54, %v293_v53  ;;  %v635_v57 = vld [vmem:[#allocation8 + $0x68] sm:$0xff]  ;;  %v637_v62 = vld [vmem:[#allocation8 + $0x78] sm:$0xff]  ;;  %v638_v0 = vld [vmem:[#allocation8 + $0x80] sm:$0xff] }
  0x8a   :  { %195 = vrot.lane.b32.xlu1 %v190_v10, %s3713_s29  ;;  %193 = vrot.lane.b32.xlu0 %v189_v11, %s3713_s29  ;;  %v3255_v59 = vpack.c.bf16 %v635_v57, %v634_v56  ;;  %v3259_v63 = vpack.c.bf16 %v637_v62, %v636_v61  ;;  %v639_v1 = vld [vmem:[#allocation8 + $0x88] sm:$0xff]  ;;  %v808_v5 = vld [vmem:[#allocation8 + $0x90] sm:$0xff]  ;;  %v809_v6 = vld [vmem:[#allocation8 + $0x98] sm:$0xff] }
  0x8b   :  { %v3263_v3 = vpack.c.bf16 %v639_v1, %v638_v0  ;;  %v3275_v7 = vpack.c.bf16 %v809_v6, %v808_v5  ;;  %v810_v8 = vld [vmem:[#allocation8 + $0xa0] sm:$0xff]  ;;  %v811_v9 = vld [vmem:[#allocation8 + $0xa8] sm:$0xff]  ;;  %v812_v11 = vld [vmem:[#allocation8 + $0xb0] sm:$0xff] }
  0x8c   :  { %v3279_v10 = vpack.c.bf16 %v811_v9, %v810_v8  ;;  %v813_v12 = vld [vmem:[#allocation8 + $0xb8] sm:$0xff]  ;;  %v1076_v25 = vld [vmem:[#allocation11 + $0x90] sm:$0xff]  ;;  %v2616_v31 = vld [vmem:[%s4100_s3] ss:$0 sm:$0xff] }
  0x8d   :  { %v3283_v13 = vpack.c.bf16 %v813_v12, %v812_v11  ;;  %v1077_v26 = vld [vmem:[#allocation11 + $0x98] sm:$0xff]  ;;  %v1230_v43 = vld [vmem:[#allocation9 + $0x10] sm:$0xff]  ;;  %v1313_v56 = vld [vmem:[#allocation11 + $0x100] sm:$0xff] }
  0x8e   :  { %v1308_v46 = vld [vmem:[#allocation11 + $0xd8] sm:$0xff]  ;;  %v1080_v54 = vld [vmem:[#allocation11 + $0xb0] sm:$0xff]  ;;  %v983_v0 = vld [vmem:[#allocation11 + $0x8] sm:$0xff] }
  0x8f   :  { %v1316_v61 = vld [vmem:[#allocation11 + $0x118] sm:$0xff]  ;;  %v986_v9 = vld [vmem:[#allocation11 + $0x20] sm:$0xff]  ;;  %vm2580_vm12 = vmor %vm2579_vm11, %vm2578_vm10 }
  0x90   :  { %v985_v5 = vld [vmem:[#allocation11 + $0x18] sm:$0xff] }
  0xf0   :  { %v162_v14 = vpop.permute.xlu1 %161  ;;  %v148_v15 = vpop.permute.xlu0 %147 }
  0xf1   :  { %154 = vst.msk [vmem:[#allocation2] sm:$0xff] %vm153_vm2, %v148_v15  ;;  %v3716_v15 = vmov 0.0  }
  0xf2   :  { %168 = vst.msk [vmem:[#allocation2] sm:$0xff] %vm167_vm3, %v162_v14  ;;  %v3714_v14 = vmov 0.0|0.0  }
  0xf4   :  { %v164_v16 = vpop.permute.xlu1 %163  ;;  %v150_v17 = vpop.permute.xlu0 %149 }
  0xf5   :  { %155 = vst.msk [vmem:[#allocation2 + $0x8] sm:$0xff] %vm153_vm2, %v150_v17  ;;  %v1071_v17 = vld [vmem:[#allocation11 + $0x68] sm:$0xff] }
  0xf6   :  { %169 = vst.msk [vmem:[#allocation2 + $0x8] sm:$0xff] %vm167_vm3, %v164_v16  ;;  %v1070_v16 = vld [vmem:[#allocation11 + $0x60] sm:$0xff] }
  0xf8   :  { %v183_v18 = vpop.permute.xlu1 %182  ;;  %v181_v19 = vpop.permute.xlu0 %180 }
  0xf9   :  { %187 = vst.msk [vmem:[#allocation2 + $0x18] sm:$0xff] %vm153_vm2, %v183_v18  ;;  %186 = vst.msk [vmem:[#allocation2 + $0x10] sm:$0xff] %vm153_vm2, %v181_v19  ;;  %v201_v22 = vld [vmem:[#allocation2] sm:$0xff]  ;;  %v1072_v18 = vld [vmem:[#allocation11 + $0x70] sm:$0xff]  ;;  %v3294_v19 = vpack.c.bf16 %v1071_v17, %v1070_v16 }
  0xfa   :  { %v1392_v16 = vld [vmem:[#allocation9 + $0x18] sm:$0xff]  ;;  %v988_v17 = vld [vmem:[#allocation11 + $0x30] sm:$0xff] }
  0xfc   :  { %v196_v20 = vpop.permute.xlu1 %195  ;;  %v194_v21 = vpop.permute.xlu0 %193 }
  0xfd   :  { %200 = vst.msk [vmem:[#allocation2 + $0x18] sm:$0xff] %vm167_vm3, %v196_v20  ;;  %199 = vst.msk [vmem:[#allocation2 + $0x10] sm:$0xff] %vm167_vm3, %v194_v21  ;;  %v202_v23 = vld [vmem:[#allocation2 + $0x8] sm:$0xff]  ;;  %v1073_v20 = vld [vmem:[#allocation11 + $0x78] sm:$0xff] }
  0xfe   :  { %v3207_v24 = vpack.c.bf16 %v202_v23, %v201_v22  ;;  %v3297_v21 = vpack.c.bf16 %v1073_v20, %v1072_v18  ;;  %v1074_v22 = vld [vmem:[#allocation11 + $0x80] sm:$0xff]  ;;  %v1075_v23 = vld [vmem:[#allocation11 + $0x88] sm:$0xff]  ;;  %v989_v18 = vld [vmem:[#allocation11 + $0x38] sm:$0xff] }
  0xff   :  { %v990_v20 = vld [vmem:[#allocation11 + $0x40] sm:$0xff] }
 0x100   :  { %3208 = vmatprep.subr.bf16.mxu0 %v3207_v24  ;;  %3216 = vmatprep.subr.bf16.mxu1 %v3207_v24 }
 0x101   :  { %3210 = vmatpush3.bf16.msra.mxu0 %v3207_v24  ;;  %3218 = vmatpush3.bf16.msra.mxu1 %v3207_v24 }
 0x104   :  { %v203_v27 = vld [vmem:[#allocation2 + $0x10] sm:$0xff]  ;;  %v204_v28 = vld [vmem:[#allocation2 + $0x18] sm:$0xff] }
 0x105   :  { %v3211_v29 = vpack.c.bf16 %v204_v28, %v203_v27  ;;  %v3303_v27 = vpack.c.bf16 %v1077_v26, %v1076_v25  ;;  %v1078_v28 = vld [vmem:[#allocation11 + $0xa0] sm:$0xff] }
 0x106   :  { %v1467_v26 = vld [vmem:[#allocation11 + $0x120] sm:$0xff] }
 0x107   :  { %3212 = vmatprep.subr.bf16.mxu0 %v3211_v29  ;;  %3220 = vmatprep.subr.bf16.mxu1 %v3211_v29 }
 0x108   :  { %3214 = vmatpush3.bf16.msra.mxu0 %v3211_v29  ;;  %3222 = vmatpush3.bf16.msra.mxu1 %v3211_v29 }
 0x109   :  { %3248 = vmatprep.subr.bf16.mxu1 %v3207_v24  ;;  %3224 = vmatprep.subr.bf16.mxu0 %v3223_v30 }
 0x10b   :  { %2849 = vmatmul.mubr.msk.f32.vlgmr.msra.gmra.mrb[0].mxu1 %vm207_vm1, %v297_v33  ;;  %2838 = vmatmul.mubr.msk.f32.vlgmr.msra.gmra.mrb[0].mxu0 %vm207_vm1, %v206_v34 }
 0x10c   :  { %3250 = vmatpush3.bf16.msra.mxu1 %v3207_v24  ;;  %2889 = vmatprep.mubr.msk.f32.mxu1 %vm207_vm1, %v550_v35 }
 0x10d   :  { %3252 = vmatprep.subr.bf16.mxu1 %v3211_v29  ;;  %3226 = vmatpush3.bf16.msra.mxu0 %v3223_v30 }
 0x10e   :  { %3228 = vmatprep.subr.bf16.mxu0 %v3227_v36 }
 0x110   :  { %3254 = vmatpush3.bf16.msra.mxu1 %v3211_v29 }
 0x111   :  { %3268 = vmatprep.subr.bf16.mxu1 %v3207_v24  ;;  %3230 = vmatpush3.bf16.msra.mxu0 %v3227_v36 }
 0x112   :  { %3232 = vmatprep.subr.bf16.mxu0 %v3231_v39 }
 0x113   :  { %2890 = vmatmul.mubr.msk.f32.vlgmr.msra.gmra.mrb[2].mxu1 %vm207_vm1, %v551_v40  ;;  %v995_v40 = vld [vmem:[#allocation9 + $0x8] sm:$0xff] }
 0x114   :  { %3270 = vmatpush3.bf16.msra.mxu1 %v3207_v24  ;;  %2915 = vmatprep.mubr.msk.f32.mxu1 %vm207_vm1, %v724_v41  ;;  %v3300_v24 = vpack.c.bf16 %v1075_v23, %v1074_v22  ;;  %v1305_v41 = vld [vmem:[#allocation11 + $0xc0] sm:$0xff]  ;;  %v992_v23 = vld [vmem:[#allocation11 + $0x50] sm:$0xff] }
 0x115   :  { %3272 = vmatprep.subr.bf16.mxu1 %v3211_v29  ;;  %3234 = vmatpush3.bf16.msra.mxu0 %v3231_v39  ;;  %v908_v39 = vld [vmem:[#allocation9] sm:$0xff] }
 0x116   :  { %3236 = vmatprep.subr.bf16.mxu0 %v3235_v45 }
 0x118   :  { %3274 = vmatpush3.bf16.msra.mxu1 %v3211_v29  ;;  %v1079_v29 = vld [vmem:[#allocation11 + $0xa8] sm:$0xff] }
 0x119   :  { %3287 = vmatprep.subr.bf16.mxu1 %v3714_v14  ;;  %v3306_v30 = vpack.c.bf16 %v1079_v29, %v1078_v28  ;;  %v1469_v29 = vld [vmem:[#allocation11 + $0x130] sm:$0xff] }
 0x11b   :  { %2916 = vmatmul.mubr.msk.f32.vlgmr.msra.gmra.mrb[4].mxu1 %vm207_vm1, %v725_v42  ;;  %v1306_v42 = vld [vmem:[#allocation11 + $0xc8] sm:$0xff] }
 0x11c   :  { %2937 = vmatprep.mubr.msk.f32.mxu1 %vm3715_vm5, %v3716_v15  ;;  %v3333_v44 = vpack.c.bf16 %v1306_v42, %v1305_v41  ;;  %v1477_v41 = vld [vmem:[#allocation11 + $0x170] sm:$0xff]  ;;  %v1478_v42 = vld [vmem:[#allocation11 + $0x178] sm:$0xff] }
 0x1de   :  { %v2850_v48 = vpop.f32.mrb[0].mxu1  ;;  %v2839_v49 = vpop.f32.mrb[0].mxu0 }
 0x1df   :  { %v370_v50 = vpop.f32.mrb[1].mxu1  ;;  %v280_v52 = vpop.f32.mrb[1].mxu0 }
 0x1e0   :  { %2863 = vmatprep.mubr.msk.f32.mxu0 %vm386_vm4, %v370_v50 }
 0x1e1   :  { %2864 = vmatmul.mubr.msk.f32.vlgmr.msra.gmra.mrb[2].mxu0 %vm386_vm4, %v2850_v48  ;;  %v1309_v48 = vld [vmem:[#allocation11 + $0xe0] sm:$0xff] }
 0x1e2   :  { %3238 = vmatpush3.bf16.msra.mxu0 %v3235_v45  ;;  %2878 = vmatprep.mubr.msk.f32.mxu0 %vm386_vm4, %v280_v52  ;;  %v1307_v45 = vld [vmem:[#allocation11 + $0xd0] sm:$0xff]  ;;  %v1312_v52 = vld [vmem:[#allocation11 + $0xf8] sm:$0xff] }
 0x1e3   :  { %3240 = vmatprep.subr.bf16.mxu0 %v3239_v51  ;;  %v3336_v47 = vpack.c.bf16 %v1308_v46, %v1307_v45 }
 0x1e6   :  { %3242 = vmatpush3.bf16.msra.mxu0 %v3239_v51  ;;  %v2891_v58 = vpop.f32.mrb[2].mxu1  ;;  %v1311_v51 = vld [vmem:[#allocation11 + $0xf0] sm:$0xff] }
 0x1e7   :  { %3244 = vmatprep.subr.bf16.mxu0 %v3243_v55  ;;  %v624_v60 = vpop.f32.mrb[3].mxu1  ;;  %v3342_v53 = vpack.c.bf16 %v1312_v52, %v1311_v51 }
 0x1ea   :  { %3246 = vmatpush3.bf16.msra.mxu0 %v3243_v55  ;;  %v1081_v55 = vld [vmem:[#allocation11 + $0xb8] sm:$0xff] }
 0x1eb   :  { %3256 = vmatprep.subr.bf16.mxu0 %v3255_v59  ;;  %v3309_v57 = vpack.c.bf16 %v1081_v55, %v1080_v54  ;;  %v1637_v54 = vld [vmem:[#allocation12] sm:$0xff]  ;;  %v1638_v55 = vld [vmem:[#allocation12 + $0x8] sm:$0xff] }
 0x1ed   :  { %2879 = vmatmul.mubr.msk.f32.vlgmr.msra.gmra.mrb[2].mxu0 %vm386_vm4, %v2839_v49  ;;  %v1310_v49 = vld [vmem:[#allocation11 + $0xe8] sm:$0xff] }
 0x1ee   :  { %3258 = vmatpush3.bf16.msra.mxu0 %v3255_v59  ;;  %2904 = vmatprep.mubr.msk.f32.mxu0 %vm386_vm4, %v624_v60  ;;  %v2917_v2 = vpop.f32.mrb[4].mxu1  ;;  %v3339_v50 = vpack.c.bf16 %v1310_v49, %v1309_v48  ;;  %v1315_v60 = vld [vmem:[#allocation11 + $0x110] sm:$0xff] }
 0x1ef   :  { %3260 = vmatprep.subr.bf16.mxu0 %v3259_v63  ;;  %v798_v4 = vpop.f32.mrb[5].mxu1  ;;  %v3348_v62 = vpack.c.bf16 %v1316_v61, %v1315_v60  ;;  %v1641_v60 = vld [vmem:[#allocation12 + $0x20] sm:$0xff]  ;;  %v1642_v61 = vld [vmem:[#allocation12 + $0x28] sm:$0xff] }
 0x1f2   :  { %3262 = vmatpush3.bf16.msra.mxu0 %v3259_v63  ;;  %v982_v63 = vld [vmem:[#allocation11] sm:$0xff] }
 0x1f3   :  { %3264 = vmatprep.subr.bf16.mxu0 %v3263_v3 }
 0x1f6   :  { %3266 = vmatpush3.bf16.msra.mxu0 %v3263_v3  ;;  %v3312_v3 = vpack.c.bf16 %v983_v0, %v982_v63  ;;  %v1643_v63 = vld [vmem:[#allocation12 + $0x30] sm:$0xff]  ;;  %v1644_v0 = vld [vmem:[#allocation12 + $0x38] sm:$0xff] }
 0x1f7   :  { %3276 = vmatprep.subr.bf16.mxu0 %v3275_v7 }
 0x1f9   :  { %2905 = vmatmul.mubr.msk.f32.vlgmr.msra.gmra.mrb[2].mxu0 %vm386_vm4, %v2891_v58  ;;  %v1314_v58 = vld [vmem:[#allocation11 + $0x108] sm:$0xff] }
 0x1fa   :  { %3278 = vmatpush3.bf16.msra.mxu0 %v3275_v7  ;;  %2930 = vmatprep.mubr.msk.f32.mxu0 %vm386_vm4, %v798_v4  ;;  %v3345_v59 = vpack.c.bf16 %v1314_v58, %v1313_v56  ;;  %v984_v4 = vld [vmem:[#allocation11 + $0x10] sm:$0xff]  ;;  %v3390_v56 = vpack.c.bf16 %v1638_v55, %v1637_v54  ;;  %v1640_v58 = vld [vmem:[#allocation12 + $0x18] sm:$0xff]  ;;  %v2126_v54 = vld [vmem:[#allocation12 + $0x148] sm:$0xff] }
 0x1fb   :  { %3280 = vmatprep.subr.bf16.mxu0 %v3279_v10  ;;  %v3315_v8 = vpack.c.bf16 %v985_v5, %v984_v4  ;;  %v1647_v5 = vld [vmem:[#allocation12 + $0x50] sm:$0xff] }
 0x1fe   :  { %3282 = vmatpush3.bf16.msra.mxu0 %v3279_v10  ;;  %v987_v10 = vld [vmem:[#allocation11 + $0x28] sm:$0xff] }
 0x1ff   :  { %3284 = vmatprep.subr.bf16.mxu0 %v3283_v13 }
 0x202   :  { %3286 = vmatpush3.bf16.msra.mxu0 %v3283_v13  ;;  %v3318_v13 = vpack.c.bf16 %v987_v10, %v986_v9  ;;  %v2625_v9 = vld [vmem:[%s4103_s6] ss:$0 sm:$0xff] }
 0x203   :  { %3293 = vmatprep.subr.bf16.mxu0 %v3714_v14 }
 0x205   :  { %2931 = vmatmul.mubr.msk.f32.vlgmr.msra.gmra.mrb[2].mxu0 %vm386_vm4, %v2917_v2 }
 0x206   :  { %2971 = vmatprep.mubr.msk.f32.mxu0 %vm3715_vm5, %v3716_v15  ;;  %3295 = vmatpush3.bf16.msra.mxu0 %v3294_v19  ;;  %v3321_v19 = vpack.c.bf16 %v989_v18, %v988_v17  ;;  %v1725_v17 = vld [vmem:[#allocation12 + $0x60] sm:$0xff]  ;;  %v1726_v18 = vld [vmem:[#allocation12 + $0x68] sm:$0xff] }
 0x207   :  { %3296 = vmatprep.subr.bf16.mxu0 %v3714_v14 }
 0x20a   :  { %3298 = vmatpush3.bf16.msra.mxu0 %v3297_v21  ;;  %v991_v21 = vld [vmem:[#allocation11 + $0x48] sm:$0xff] }
 0x20b   :  { %3299 = vmatprep.subr.bf16.mxu0 %v3714_v14  ;;  %v3324_v22 = vpack.c.bf16 %v991_v21, %v990_v20  ;;  %v3372_v20 = vpack.c.bf16 %v1726_v18, %v1725_v17  ;;  %v1727_v21 = vld [vmem:[#allocation12 + $0x70] sm:$0xff] }
 0x20e   :  { %3301 = vmatpush3.bf16.msra.mxu0 %v3300_v24  ;;  %v993_v24 = vld [vmem:[#allocation11 + $0x58] sm:$0xff] }
 0x20f   :  { %3302 = vmatprep.subr.bf16.mxu0 %v3714_v14  ;;  %v3327_v25 = vpack.c.bf16 %v993_v24, %v992_v23  ;;  %v1729_v24 = vld [vmem:[#allocation12 + $0x80] sm:$0xff] }
 0x212   :  { %3304 = vmatpush3.bf16.msra.mxu0 %v3303_v27  ;;  %v1468_v27 = vld [vmem:[#allocation11 + $0x128] sm:$0xff] }
 0x213   :  { %3305 = vmatprep.subr.bf16.mxu0 %v3714_v14  ;;  %v3354_v28 = vpack.c.bf16 %v1468_v27, %v1467_v26  ;;  %v1731_v27 = vld [vmem:[#allocation12 + $0x90] sm:$0xff] }
 0x216   :  { %3307 = vmatpush3.bf16.msra.mxu0 %v3306_v30  ;;  %v1470_v30 = vld [vmem:[#allocation11 + $0x138] sm:$0xff] }
 0x217   :  { %3308 = vmatprep.subr.bf16.mxu0 %v3714_v14 }
 0x21a   :  { %3310 = vmatpush3.bf16.msra.mxu0 %v3309_v57  ;;  %v1639_v57 = vld [vmem:[#allocation12 + $0x10] sm:$0xff] }
 0x21b   :  { %3311 = vmatprep.subr.bf16.mxu0 %v3714_v14 }
 0x2d8   :  { %v2932_v32 = vpop.f32.mrb[2].mxu0 }
 0x2d9   :  { %v905_v33 = vadd.f32 %v2932_v32, %v2616_v31  ;;  %v886_v34 = vpop.f32.mrb[3].mxu0  ;;  %v1471_v32 = vld [vmem:[#allocation11 + $0x140] sm:$0xff] }
 0x2da   :  { %v904_v35 = vadd.f32 %v2616_v31, %v886_v34  ;;  %v3357_v31 = vpack.c.bf16 %v1470_v30, %v1469_v29  ;;  %v1733_v30 = vld [vmem:[#allocation12 + $0xa0] sm:$0xff] }
 0x2db   :  { %v907_v36 = vmax.f32 %v905_v33, 0.0  ;;  %v1472_v33 = vld [vmem:[#allocation11 + $0x148] sm:$0xff] }
 0x2dc   :  { %v906_v37 = vmax.f32 %v904_v35, 0.0  ;;  %v3360_v34 = vpack.c.bf16 %v1472_v33, %v1471_v32  ;;  %v1473_v35 = vld [vmem:[#allocation11 + $0x150] sm:$0xff] }
 0x2dd   :  { %v1735_v33 = vld [vmem:[#allocation12 + $0xb0] sm:$0xff] }
 0x2de   :  { %v3950_v38 = vpack.c.bf16 %v907_v36, %v906_v37  ;;  %v1474_v36 = vld [vmem:[#allocation11 + $0x158] sm:$0xff] }
 0x2df   :  { %v3363_v37 = vpack.c.bf16 %v1474_v36, %v1473_v35 }
 0x2e0   :  { %3289 = vmatpush3.bf16.msra.mxu1 %v3950_v38 }
 0x2e1   :  { %3290 = vmatprep.subr.bf16.mxu1 %v3714_v14 }
 0x2e3   :  { %2938 = vmatmul.mubr.msk.f32.vlgmr.msra.gmra.mrb[6].mxu1 %vm139_vm0, %v908_v39  ;;  %v1476_v39 = vld [vmem:[#allocation11 + $0x168] sm:$0xff] }
 0x2e4   :  { %3292 = vmatpush3.bf16.msra.mxu1 %v3950_v38  ;;  %2944 = vmatprep.mubr.msk.f32.mxu1 %vm3715_vm5, %v3716_v15 }
 0x2e5   :  { %3329 = vmatprep.subr.bf16.mxu1 %v3714_v14 }
 0x2e7   :  { %2945 = vmatmul.mubr.msk.f32.vlgmr.msra.gmra.mrb[8].mxu1 %vm139_vm0, %v995_v40 }
 0x2e8   :  { %3331 = vmatpush3.bf16.msra.mxu1 %v3950_v38  ;;  %3005 = vmatprep.mubr.msk.f32.mxu1 %vm3715_vm5, %v3716_v15 }
 0x2e9   :  { %3332 = vmatprep.subr.bf16.mxu1 %v3714_v14 }
 0x2eb   :  { %3006 = vmatmul.mubr.msk.f32.vlgmr.msra.gmra.mrb[10].mxu1 %vm139_vm0, %v1230_v43  ;;  %v3369_v43 = vpack.c.bf16 %v1478_v42, %v1477_v41  ;;  %v1959_v41 = vld [vmem:[#allocation12 + $0xc0] sm:$0xff]  ;;  %v1960_v42 = vld [vmem:[#allocation12 + $0xc8] sm:$0xff] }
 0x2ec   :  { %3334 = vmatpush3.bf16.msra.mxu1 %v3333_v44  ;;  %3032 = vmatprep.mubr.msk.f32.mxu1 %vm3715_vm5, %v3716_v15 }
 0x2ed   :  { %3335 = vmatprep.subr.bf16.mxu1 %v3714_v14 }
 0x2f0   :  { %3337 = vmatpush3.bf16.msra.mxu1 %v3336_v47 }
 0x2f1   :  { %3338 = vmatprep.subr.bf16.mxu1 %v3714_v14 }
 0x2f4   :  { %3340 = vmatpush3.bf16.msra.mxu1 %v3339_v50 }
 0x2f5   :  { %3341 = vmatprep.subr.bf16.mxu1 %v3714_v14 }
 0x2f8   :  { %3343 = vmatpush3.bf16.msra.mxu1 %v3342_v53 }
 0x2f9   :  { %3344 = vmatprep.subr.bf16.mxu1 %v3714_v14 }
 0x2fc   :  { %3346 = vmatpush3.bf16.msra.mxu1 %v3345_v59  ;;  %v3393_v59 = vpack.c.bf16 %v1640_v58, %v1639_v57  ;;  %v1964_v57 = vld [vmem:[#allocation12 + $0xe8] sm:$0xff] }
 0x2fd   :  { %3347 = vmatprep.subr.bf16.mxu1 %v3714_v14 }
 0x300   :  { %3349 = vmatpush3.bf16.msra.mxu1 %v3348_v62  ;;  %v3396_v62 = vpack.c.bf16 %v1642_v61, %v1641_v60  ;;  %v2128_v60 = vld [vmem:[#allocation12 + $0x158] sm:$0xff] }
 0x301   :  { %3350 = vmatprep.subr.bf16.mxu1 %v3714_v14 }
 0x3b6   :  { %v978_v1 = vpop.f32.mrb[6].mxu1 }
 0x3b7   :  { %v2939_v2 = vpop.f32.mrb[7].mxu1 }
 0x3b8   :  { %v1645_v2 = vld [vmem:[#allocation12 + $0x40] sm:$0xff] }
 0x3ba   :  { %v1065_v6 = vpop.f32.mrb[8].mxu1 }
 0x3bb   :  { %v2946_v7 = vpop.f32.mrb[9].mxu1  ;;  %2972 = vmatmul.mubr.msk.f32.vlgmr.msra.gmra.mrb[4].mxu0 %vm1082_vm6, %v1065_v6  ;;  %v1648_v6 = vld [vmem:[#allocation12 + $0x58] sm:$0xff] }
 0x3bc   :  { %3313 = vmatpush3.bf16.msra.mxu0 %v3312_v3  ;;  %2998 = vmatprep.mubr.msk.f32.mxu0 %vm3715_vm5, %v3716_v15  ;;  %v1646_v3 = vld [vmem:[#allocation12 + $0x48] sm:$0xff]  ;;  %v3405_v7 = vpack.c.bf16 %v1648_v6, %v1647_v5  ;;  %v2129_v5 = vld [vmem:[#allocation12 + $0x160] sm:$0xff] }
 0x3bd   :  { %3314 = vmatprep.subr.bf16.mxu0 %v3714_v14  ;;  %v3402_v4 = vpack.c.bf16 %v1646_v3, %v1645_v2  ;;  %v1967_v2 = vld [vmem:[#allocation12 + $0x100] sm:$0xff]  ;;  %v1968_v3 = vld [vmem:[#allocation12 + $0x108] sm:$0xff] }
 0x3be   :  { %v1300_v11 = vpop.f32.mrb[10].mxu1  ;;  %v2130_v6 = vld [vmem:[#allocation12 + $0x168] sm:$0xff] }
 0x3bf   :  { %v3007_v12 = vpop.f32.mrb[11].mxu1  ;;  %3033 = vmatmul.mubr.msk.f32.vlgmr.msra.gmra.mrb[12].mxu1 %vm1082_vm6, %v1300_v11 }
 0x3c0   :  { %3316 = vmatpush3.bf16.msra.mxu0 %v3315_v8  ;;  %3352 = vmatpush3.bf16.msra.mxu1 %v3950_v38  ;;  %v1475_v38 = vld [vmem:[#allocation11 + $0x160] sm:$0xff] }
 0x3c1   :  { %3317 = vmatprep.subr.bf16.mxu0 %v3714_v14  ;;  %3039 = vmatprep.mubr.msk.f32.mxu1 %vm3715_vm5, %v3716_v15  ;;  %v3366_v40 = vpack.c.bf16 %v1476_v39, %v1475_v38  ;;  %v2122_v38 = vld [vmem:[#allocation12 + $0x128] sm:$0xff] }
 0x3c2   :  { %3069 = vmatprep.subr.mxu1 %v3716_v15 }
 0x3c3   :  { %3040 = vmatmul.mubr.msk.f32.vlgmr.msra.gmra.mrb[14].mxu1 %vm139_vm0, %v1392_v16  ;;  %v1562_v16 = vld [vmem:[%s4104_s7] sm:$0xf] }
 0x3c4   :  { %3319 = vmatpush3.bf16.msra.mxu0 %v3318_v13  ;;  %3071 = vmatprep.mubr.msk.f32.mxu1 %vm3715_vm5, %v3716_v15 }
 0x3c5   :  { %3320 = vmatprep.subr.bf16.mxu0 %v3714_v14 }
 0x3c8   :  { %3322 = vmatpush3.bf16.msra.mxu0 %v3321_v19  ;;  %v2627_v19 = vld [vmem:[%s4104_s7 + $0x4] sm:$0xf] }
 0x3c9   :  { %3323 = vmatprep.subr.bf16.mxu0 %v3714_v14 }
 0x3cc   :  { %3325 = vmatpush3.bf16.msra.mxu0 %v3324_v22  ;;  %v1728_v22 = vld [vmem:[#allocation12 + $0x78] sm:$0xff] }
 0x3cd   :  { %3326 = vmatprep.subr.bf16.mxu0 %v3714_v14  ;;  %v3375_v23 = vpack.c.bf16 %v1728_v22, %v1727_v21 }
 0x3d0   :  { %3328 = vmatpush3.bf16.msra.mxu0 %v3327_v25  ;;  %v1730_v25 = vld [vmem:[#allocation12 + $0x88] sm:$0xff] }
 0x3d1   :  { %3353 = vmatprep.subr.bf16.mxu0 %v3714_v14  ;;  %v3378_v26 = vpack.c.bf16 %v1730_v25, %v1729_v24 }
 0x3d3   :  { %2999 = vmatmul.mubr.msk.f32.vlgmr.msra.gmra.mrb[6].mxu0 %vm1082_vm6, %v978_v1  ;;  %v3399_v1 = vpack.c.bf16 %v1644_v0, %v1643_v63  ;;  %v1966_v63 = vld [vmem:[#allocation12 + $0xf8] sm:$0xff] }
 0x3d4   :  { %3355 = vmatpush3.bf16.msra.mxu0 %v3354_v28  ;;  %3066 = vmatprep.mubr.msk.f32.mxu0 %vm3715_vm5, %v3716_v15  ;;  %v1732_v28 = vld [vmem:[#allocation12 + $0x98] sm:$0xff] }
 0x3d5   :  { %3356 = vmatprep.subr.bf16.mxu0 %v3714_v14  ;;  %v3381_v29 = vpack.c.bf16 %v1732_v28, %v1731_v27 }
 0x3d8   :  { %3358 = vmatpush3.bf16.msra.mxu0 %v3357_v31  ;;  %v1734_v31 = vld [vmem:[#allocation12 + $0xa8] sm:$0xff] }
 0x3d9   :  { %3359 = vmatprep.subr.bf16.mxu0 %v3714_v14  ;;  %v3384_v32 = vpack.c.bf16 %v1734_v31, %v1733_v30 }
 0x3dc   :  { %3361 = vmatpush3.bf16.msra.mxu0 %v3360_v34  ;;  %v1736_v34 = vld [vmem:[#allocation12 + $0xb8] sm:$0xff] }
 0x3dd   :  { %3362 = vmatprep.subr.bf16.mxu0 %v3714_v14  ;;  %v3387_v35 = vpack.c.bf16 %v1736_v34, %v1735_v33  ;;  %v2398_v33 = vld [vmem:[#allocation14 + $0xd8] sm:$0xff] }
 0x3e0   :  { %3364 = vmatpush3.bf16.msra.mxu0 %v3363_v37  ;;  %v2121_v37 = vld [vmem:[#allocation12 + $0x120] sm:$0xff] }
 0x3e1   :  { %3365 = vmatprep.subr.bf16.mxu0 %v3714_v14 }
 0x3e4   :  { %3367 = vmatpush3.bf16.msra.mxu0 %v3366_v40  ;;  %v2634_v40 = vld [vmem:[%s4104_s7 + $0xc] sm:$0xf] }
 0x3e5   :  { %3368 = vmatprep.subr.bf16.mxu0 %v3714_v14 }
 0x3e8   :  { %3370 = vmatpush3.bf16.msra.mxu0 %v3369_v43  ;;  %v3426_v43 = vpack.c.bf16 %v2122_v38, %v2121_v37  ;;  %v2395_v37 = vld [vmem:[#allocation14 + $0xc0] sm:$0xff]  ;;  %v2397_v38 = vld [vmem:[#allocation14 + $0xd0] sm:$0xff] }
 0x3e9   :  { %3389 = vmatprep.subr.bf16.mxu0 %v3714_v14 }
 0x48e   :  { %v1152_v44 = vpop.f32.mrb[4].mxu0 }
 0x48f   :  { %v2973_v45 = vpop.f32.mrb[5].mxu0 }
 0x490   :  { %v2123_v45 = vld [vmem:[#allocation12 + $0x130] sm:$0xff] }
 0x492   :  { %v1386_v46 = vpop.f32.mrb[12].mxu1 }
 0x493   :  { %v3034_v47 = vpop.f32.mrb[13].mxu1 }
 0x496   :  { %v1462_v48 = vpop.f32.mrb[14].mxu1 }
 0x497   :  { %v3041_v49 = vpop.f32.mrb[15].mxu1  ;;  %3067 = vmatmul.mubr.msk.f32.vlgmr.msra.gmra.mrb[8].mxu0 %vm1082_vm6, %v1462_v48  ;;  %v2631_v48 = vld [vmem:[%s4104_s7 + $0x8] sm:$0xf] }
 0x498   :  { %3130 = vmatprep.mubr.msk.f32.mxu0 %vm3715_vm5, %v3716_v15  ;;  %3391 = vmatpush3.bf16.msra.mxu0 %v3390_v56  ;;  %v3408_v49 = vpack.c.bf16 %v1960_v42, %v1959_v41  ;;  %v1963_v56 = vld [vmem:[#allocation12 + $0xe0] sm:$0xff]  ;;  %v3445_v42 = vpack.c.bf16 %v2397_v38, %v2395_v37 }
 0x499   :  { %3392 = vmatprep.subr.bf16.mxu0 %v3714_v14  ;;  %v3414_v61 = vpack.c.bf16 %v1964_v57, %v1963_v56  ;;  %v2640_v41 = vld [vmem:[%s4107_s10 + $0x2] sm:$0x3]  ;;  %v2409_v57 = vld [vmem:[#allocation14 + $0x130] sm:$0xff] }
 0x49a   :  { %v2407_v56 = vld [vmem:[#allocation14 + $0x120] sm:$0xff] }
 0x49c   :  { %3394 = vmatpush3.bf16.msra.mxu0 %v3393_v59  ;;  %v2127_v59 = vld [vmem:[#allocation12 + $0x150] sm:$0xff] }
 0x49d   :  { %3395 = vmatprep.subr.bf16.mxu0 %v3714_v14  ;;  %v3435_v0 = vpack.c.bf16 %v2128_v60, %v2127_v59  ;;  %v2414_v59 = vld [vmem:[#allocation14 + $0x158] sm:$0xff]  ;;  %v3457_v60 = vpack.c.bf16 %v2409_v57, %v2407_v56 }
 0x4a0   :  { %3397 = vmatpush3.bf16.msra.mxu0 %v3396_v62  ;;  %v1965_v62 = vld [vmem:[#allocation12 + $0xf0] sm:$0xff] }
 0x4a1   :  { %3398 = vmatprep.subr.bf16.mxu0 %v3714_v14 }
 0x4a4   :  { %3400 = vmatpush3.bf16.msra.mxu0 %v3399_v1  ;;  %v3417_v1 = vpack.c.bf16 %v1966_v63, %v1965_v62  ;;  %v2411_v62 = vld [vmem:[#allocation14 + $0x140] sm:$0xff]  ;;  %v2413_v63 = vld [vmem:[#allocation14 + $0x150] sm:$0xff] }
 0x4a5   :  { %3401 = vmatprep.subr.bf16.mxu0 %v3714_v14 }
 0x4a6   :  { %v1225_v50 = vpop.f32.mrb[6].mxu0 }
 0x4a7   :  { %v1226_v51 = vadd.f32 %v1225_v50, %v1152_v44  ;;  %v3000_v52 = vpop.f32.mrb[7].mxu0  ;;  %v1961_v50 = vld [vmem:[#allocation12 + $0xd0] sm:$0xff] }
 0x4a8   :  { %3403 = vmatpush3.bf16.msra.mxu0 %v3402_v4  ;;  %v3420_v4 = vpack.c.bf16 %v1968_v3, %v1967_v2  ;;  %v3461_v2 = vpack.c.bf16 %v2413_v63, %v2411_v62 }
 0x4a9   :  { %v1390_v53 = vadd.f32 %v1386_v46, %v1226_v51  ;;  %3404 = vmatprep.subr.bf16.mxu0 %v3714_v14  ;;  %v2124_v46 = vld [vmem:[#allocation12 + $0x138] sm:$0xff] }
 0x4aa   :  { %v1962_v51 = vld [vmem:[#allocation12 + $0xd8] sm:$0xff]  ;;  %v3429_v52 = vpack.c.bf16 %v2124_v46, %v2123_v45  ;;  %v2401_v45 = vld [vmem:[#allocation14 + $0xf0] sm:$0xff]  ;;  %v2404_v46 = vld [vmem:[#allocation14 + $0x108] sm:$0xff] }
 0x4ab   :  { %v3411_v55 = vpack.c.bf16 %v1962_v51, %v1961_v50  ;;  %v2403_v50 = vld [vmem:[#allocation14 + $0x100] sm:$0xff]  ;;  %v2405_v51 = vld [vmem:[#allocation14 + $0x110] sm:$0xff] }
 0x4ac   :  { %3406 = vmatpush3.bf16.msra.mxu0 %v3405_v7  ;;  %v3438_v7 = vpack.c.bf16 %v2130_v6, %v2129_v5  ;;  %v2417_v5 = vld [vmem:[#allocation14 + $0x170] sm:$0xff] }
 0x4ad   :  { %3165 = vmatprep.subr.mxu0 %v3716_v15 }
 0x56a   :  { %v1548_v8 = vpop.f32.mrb[8].mxu0 }
 0x56b   :  { %v1552_v10 = vadd.f32 %v1548_v8, %v1390_v53  ;;  %v3068_v11 = vpop.f32.mrb[9].mxu0  ;;  %v2125_v53 = vld [vmem:[#allocation12 + $0x140] sm:$0xff]  ;;  %v1969_v8 = vld [vmem:[#allocation12 + $0x110] sm:$0xff] }
 0x56c   :  { %v3432_v58 = vpack.c.bf16 %v2126_v54, %v2125_v53  ;;  %v2131_v11 = vld [vmem:[#allocation12 + $0x170] sm:$0xff]  ;;  %v2410_v53 = vld [vmem:[#allocation14 + $0x138] sm:$0xff]  ;;  %v3453_v54 = vpack.c.bf16 %v2405_v51, %v2403_v50 }
 0x56d   :  { %v1560_v12 = vadd.f32 %v2625_v9, %v1552_v10  ;;  %v1970_v9 = vld [vmem:[#allocation12 + $0x118] sm:$0xff] }
 0x56e   :  { %v3423_v10 = vpack.c.bf16 %v1970_v9, %v1969_v8  ;;  %v2298_v8 = vld [vmem:[#allocation14 + $0x18] sm:$0xff] }
 0x56f   :  { %v1561_v13 = vmax.f32 %v1560_v12, 0.0  ;;  %v2132_v12 = vld [vmem:[#allocation12 + $0x178] sm:$0xff] }
 0x571   :  { %3070 = vmatpush3.msra.mxu1 %v1561_v13 }
 0x572   :  { %3072 = vmatmul.mubr.msk.f32.vlgmr.msra.gmra.mrb[16].mxu1 %vm1563_vm7, %v1562_v16  ;;  %3074 = vmatprep.subr.mxu1 %v3716_v15 }
 0x573   :  { %3075 = vmatpush3.msra.mxu1 %v1561_v13  ;;  %3076 = vmatprep.mubr.msk.f32.mxu1 %vm3715_vm5, %v3716_v15 }
 0x574   :  { %3371 = vmatprep.subr.bf16.mxu1 %v3714_v14 }
 0x576   :  { %3077 = vmatmul.mubr.msk.f32.vlgmr.msra.gmra.mrb[18].mxu1 %vm1563_vm7, %v2627_v19 }
 0x577   :  { %3373 = vmatpush3.bf16.msra.mxu1 %v3372_v20  ;;  %3103 = vmatprep.mubr.msk.f32.mxu1 %vm3715_vm5, %v3716_v15 }
 0x578   :  { %3374 = vmatprep.subr.bf16.mxu1 %v3714_v14 }
 0x57b   :  { %3376 = vmatpush3.bf16.msra.mxu1 %v3375_v23 }
 0x57c   :  { %3377 = vmatprep.subr.bf16.mxu1 %v3714_v14 }
 0x57f   :  { %3379 = vmatpush3.bf16.msra.mxu1 %v3378_v26 }
 0x580   :  { %3380 = vmatprep.subr.bf16.mxu1 %v3714_v14 }
 0x583   :  { %3382 = vmatpush3.bf16.msra.mxu1 %v3381_v29  ;;  %v2637_v29 = vld [vmem:[%s4106_s9] ss:$0 sm:$0xff] }
 0x584   :  { %3383 = vmatprep.subr.bf16.mxu1 %v3714_v14 }
 0x587   :  { %3385 = vmatpush3.bf16.msra.mxu1 %v3384_v32  ;;  %v2396_v32 = vld [vmem:[#allocation14 + $0xc8] sm:$0xff] }
 0x588   :  { %3386 = vmatprep.subr.bf16.mxu1 %v3714_v14 }
 0x58b   :  { %3388 = vmatpush3.bf16.msra.mxu1 %v3387_v35  ;;  %v2216_v35 = vld [vmem:[%s4107_s10] sm:$0x3]  ;;  %s3718_s10 = smov [#allocation15]  }
 0x58c   :  { %3133 = vmatprep.subr.mxu1 %v3716_v15  ;;  %s2588_s27 = sshll.u32 %s3718_s10, 4  ;;  %s2589_s27 = int_to_ptr.vmem [resolvable:$true] %s2588_s27 }
 0x58d   :  { %s3670_s28 = scalar_lea.vmem %s2589_s27, 64  ;;  %p3675_p1 = scmp.lt.s32.totalorder %s2589_s27, %s2589_s27 }
 0x58e   :  { %p3671_p0 = scmp.ne.s32.totalorder %s2589_s27, %s3670_s28  ;;  %p3676_p2 = scmp.lt.s32.totalorder %s3670_s28, %s3670_s28 }
 0x590   :  { %p3677_p3 = por %p3676_p2, %p3675_p1 }
 0x592   :  { %p3678_p4 = pnand %p3677_p3, %p3671_p0 }
 0x645   :  { %v1633_v36 = vpop.f32.mrb[16].mxu1 }
 0x646   :  { %v3073_v39 = vpop.f32.mrb[17].mxu1  ;;  %3131 = vmatmul.mubr.msk.f32.vlgmr.msra.gmra.mrb[10].mxu0 %vm1082_vm6, %v1633_v36  ;;  %v3443_v36 = vpack.c.bf16 %v2398_v33, %v2396_v32  ;;  %v2307_v33 = vld [vmem:[#allocation14 + $0x60] sm:$0xff] }
 0x647   :  { %3166 = vmatpush3.msra.mxu0 %v1561_v13  ;;  %3167 = vmatprep.mubr.msk.f32.mxu0 %vm3715_vm5, %v3716_v15  ;;  %v2400_v39 = vld [vmem:[#allocation14 + $0xe8] sm:$0xff] }
 0x648   :  { %3425 = vmatprep.subr.bf16.mxu0 %v3714_v14 }
 0x649   :  { %v1720_v44 = vpop.f32.mrb[18].mxu1 }
 0x64a   :  { %v3078_v47 = vpop.f32.mrb[19].mxu1  ;;  %3104 = vmatmul.mubr.msk.f32.vlgmr.msra.gmra.mrb[20].mxu1 %vm1082_vm6, %v1720_v44  ;;  %3168 = vmatmul.mubr.msk.f32.vlgmr.msra.gmra.mrb[12].mxu0 %vm1563_vm7, %v2634_v40  ;;  %v2402_v40 = vld [vmem:[#allocation14 + $0xf8] sm:$0xff]  ;;  %v2399_v44 = vld [vmem:[#allocation14 + $0xe0] sm:$0xff] }
 0x64b   :  { %3134 = vmatpush3.msra.mxu1 %v1561_v13  ;;  %3135 = vmatprep.mubr.msk.f32.mxu1 %vm3715_vm5, %v3716_v15  ;;  %v3441_v13 = vpack.c.bf16 %v2132_v12, %v2131_v11  ;;  %v2406_v47 = vld [vmem:[#allocation14 + $0x118] sm:$0xff]  ;;  %v2297_v11 = vld [vmem:[#allocation14 + $0x10] sm:$0xff] }
 0x64c   :  { %3407 = vmatprep.subr.bf16.mxu1 %v3714_v14  ;;  %3427 = vmatpush3.bf16.msra.mxu0 %v3426_v43  ;;  %v3447_v43 = vpack.c.bf16 %v2402_v40, %v2400_v39  ;;  %v2311_v39 = vld [vmem:[#allocation14 + $0x80] sm:$0xff]  ;;  %v2316_v40 = vld [vmem:[#allocation14 + $0xa8] sm:$0xff] }
 0x64d   :  { %3428 = vmatprep.subr.bf16.mxu0 %v3714_v14  ;;  %3194 = vmatprep.mubr.msk.f32.mxu0 %vm3715_vm5, %v3716_v15 }
 0x64e   :  { %3136 = vmatmul.mubr.msk.f32.vlgmr.msra.gmra.mrb[22].mxu1 %vm1563_vm7, %v2631_v48  ;;  %v3449_v48 = vpack.c.bf16 %v2401_v45, %v2399_v44  ;;  %v2315_v44 = vld [vmem:[#allocation14 + $0xa0] sm:$0xff]  ;;  %v2317_v45 = vld [vmem:[#allocation14 + $0xb0] sm:$0xff] }
 0x64f   :  { %3409 = vmatpush3.bf16.msra.mxu1 %v3408_v49  ;;  %3162 = vmatprep.mubr.msk.f32.mxu1 %vm3715_vm5, %v3716_v15  ;;  %v3451_v49 = vpack.c.bf16 %v2406_v47, %v2404_v46  ;;  %v3489_v46 = vpack.c.bf16 %v2317_v45, %v2315_v44  ;;  %v3717_v47 = vmov 1983009808  }
 0x650   :  { %3410 = vmatprep.subr.bf16.mxu1 %v3714_v14  ;;  %3430 = vmatpush3.bf16.msra.mxu0 %v3429_v52  ;;  %v2408_v52 = vld [vmem:[#allocation14 + $0x128] sm:$0xff] }
 0x651   :  { %3431 = vmatprep.subr.bf16.mxu0 %v3714_v14 }
 0x653   :  { %3412 = vmatpush3.bf16.msra.mxu1 %v3411_v55  ;;  %v3455_v55 = vpack.c.bf16 %v2410_v53, %v2408_v52 }
 0x654   :  { %3413 = vmatprep.subr.bf16.mxu1 %v3714_v14  ;;  %3433 = vmatpush3.bf16.msra.mxu0 %v3432_v58  ;;  %v2412_v58 = vld [vmem:[#allocation14 + $0x148] sm:$0xff] }
 0x655   :  { %3434 = vmatprep.subr.bf16.mxu0 %v3714_v14 }
 0x657   :  { %3415 = vmatpush3.bf16.msra.mxu1 %v3414_v61  ;;  %v3459_v61 = vpack.c.bf16 %v2414_v59, %v2412_v58 }
 0x658   :  { %3416 = vmatprep.subr.bf16.mxu1 %v3714_v14  ;;  %3436 = vmatpush3.bf16.msra.mxu0 %v3435_v0  ;;  %v2416_v0 = vld [vmem:[#allocation14 + $0x168] sm:$0xff] }
 0x659   :  { %3437 = vmatprep.subr.bf16.mxu0 %v3714_v14 }
 0x65b   :  { %3418 = vmatpush3.bf16.msra.mxu1 %v3417_v1  ;;  %v2418_v1 = vld [vmem:[#allocation14 + $0x178] sm:$0xff] }
 0x65c   :  { %3419 = vmatprep.subr.bf16.mxu1 %v3714_v14  ;;  %3439 = vmatpush3.bf16.msra.mxu0 %v3438_v7  ;;  %v3463_v3 = vpack.c.bf16 %v2418_v1, %v2416_v0  ;;  %v2296_v7 = vld [vmem:[#allocation14 + $0x8] sm:$0xff] }
 0x65d   :  { %3440 = vmatprep.subr.bf16.mxu0 %v3714_v14  ;;  %v3467_v9 = vpack.c.bf16 %v2298_v8, %v2296_v7 }
 0x65f   :  { %3421 = vmatpush3.bf16.msra.mxu1 %v3420_v4  ;;  %v2415_v4 = vld [vmem:[#allocation14 + $0x160] sm:$0xff] }
 0x660   :  { %3422 = vmatprep.subr.bf16.mxu1 %v3714_v14  ;;  %3442 = vmatpush3.bf16.msra.mxu0 %v3441_v13  ;;  %v3465_v6 = vpack.c.bf16 %v2417_v5, %v2415_v4  ;;  %v2300_v13 = vld [vmem:[#allocation14 + $0x28] sm:$0xff] }
 0x663   :  { %3424 = vmatpush3.bf16.msra.mxu1 %v3423_v10  ;;  %v2295_v10 = vld [vmem:[#allocation14] sm:$0xff] }
 0x664   :  { %3197 = vmatprep.subr.mxu1 %v3716_v15 }
 0x719   :  { %v1879_v16 = vpop.f32.mrb[10].mxu0 }
 0x71a   :  { %v3132_v17 = vpop.f32.mrb[11].mxu0 }
 0x71d   :  { %v1806_v18 = vpop.f32.mrb[20].mxu1  ;;  %v2116_v19 = vpop.f32.mrb[12].mxu0 }
 0x71e   :  { %v1880_v20 = vadd.f32 %v1879_v16, %v1806_v18  ;;  %v3105_v21 = vpop.f32.mrb[21].mxu1  ;;  %v3169_v22 = vpop.f32.mrb[13].mxu0  ;;  %3195 = vmatmul.mubr.msk.f32.vlgmr.msra.gmra.mrb[14].mxu0 %vm1082_vm6, %v2116_v19  ;;  %v2302_v16 = vld [vmem:[#allocation14 + $0x38] sm:$0xff]  ;;  %v3469_v18 = vpack.c.bf16 %v2297_v11, %v2295_v10 }
 0x71f   :  { %v3471_v19 = vpack.c.bf16 %v2302_v16, %v2300_v13  ;;  %v2301_v21 = vld [vmem:[#allocation14 + $0x30] sm:$0xff] }
 0x721   :  { %v1954_v23 = vpop.f32.mrb[22].mxu1 }
 0x722   :  { %v3137_v24 = vpop.f32.mrb[23].mxu1  ;;  %3163 = vmatmul.mubr.msk.f32.vlgmr.msra.gmra.mrb[24].mxu1 %vm1082_vm6, %v1954_v23  ;;  %v2304_v23 = vld [vmem:[#allocation14 + $0x48] sm:$0xff] }
 0x723   :  { %3199 = vmatprep.mubr.msk.f32.mxu1 %vm3715_vm5, %v3716_v15  ;;  %v2306_v24 = vld [vmem:[#allocation14 + $0x58] sm:$0xff] }
 0x7f1   :  { %v2202_v14 = vpop.f32.mrb[14].mxu0 }
 0x7f2   :  { %v3196_v25 = vpop.f32.mrb[15].mxu0 }
 0x7f5   :  { %v2040_v26 = vpop.f32.mrb[24].mxu1 }
 0x7f6   :  { %v2044_v27 = vadd.f32 %v2040_v26, %v1880_v20  ;;  %v3164_v28 = vpop.f32.mrb[25].mxu1  ;;  %v2299_v20 = vld [vmem:[#allocation14 + $0x20] sm:$0xff]  ;;  %v3475_v26 = vpack.c.bf16 %v2306_v24, %v2304_v23 }
 0x7f7   :  { %v3473_v25 = vpack.c.bf16 %v2301_v21, %v2299_v20  ;;  %v2305_v28 = vld [vmem:[#allocation14 + $0x50] sm:$0xff] }
 0x7f8   :  { %v2206_v30 = vadd.f32 %v2202_v14, %v2044_v27  ;;  %v2303_v27 = vld [vmem:[#allocation14 + $0x40] sm:$0xff] }
 0x7fa   :  { %v2214_v31 = vadd.f32 %v2637_v29, %v2206_v30  ;;  %v2308_v29 = vld [vmem:[#allocation14 + $0x68] sm:$0xff]  ;;  %v2310_v30 = vld [vmem:[#allocation14 + $0x78] sm:$0xff] }
 0x7fb   :  { %v3479_v32 = vpack.c.bf16 %v2310_v30, %v2308_v29 }
 0x7fc   :  { %v2215_v34 = vmax.f32 %v2214_v31, 0.0  ;;  %v3477_v31 = vpack.c.bf16 %v2305_v28, %v2303_v27 }
 0x7fe   :  { %3198 = vmatpush3.msk.msra.mxu1 %vm2221_vm8, %v2215_v34 }
 0x7ff   :  { %3200 = vmatmul.mubr.msk.f32.vlgmr.msra.gmra.mrb[26].mxu1 %vm2217_vm9, %v2216_v35  ;;  %3202 = vmatprep.subr.mxu1 %v3716_v15  ;;  %v2312_v35 = vld [vmem:[#allocation14 + $0x88] sm:$0xff] }
 0x800   :  { %3203 = vmatpush3.msk.msra.mxu1 %vm2221_vm8, %v2215_v34  ;;  %3204 = vmatprep.mubr.msk.f32.mxu1 %vm3715_vm5, %v3716_v15  ;;  %v2309_v34 = vld [vmem:[#allocation14 + $0x70] sm:$0xff] }
 0x801   :  { %3444 = vmatprep.subr.bf16.mxu1 %v3443_v36  ;;  %v2314_v36 = vld [vmem:[#allocation14 + $0x98] sm:$0xff]  ;;  %v3481_v37 = vpack.c.bf16 %v2309_v34, %v2307_v33 }
 0x802   :  { %v3483_v38 = vpack.c.bf16 %v2314_v36, %v2312_v35 }
 0x803   :  { %3205 = vmatmul.mubr.msk.f32.vlgmr.msra.gmra.mrb[28].mxu1 %vm2217_vm9, %v2640_v41  ;;  %v2318_v41 = vld [vmem:[#allocation14 + $0xb8] sm:$0xff] }
 0x804   :  { %3446 = vmatpush1.bf16.msra.mxu1 %v3445_v42  ;;  %2486 = vmatprep.mubr.f32.mxu1 %v3716_v15 }
 0x805   :  { %3448 = vmatprep.subr.bf16.mxu1 %v3447_v43  ;;  %v3487_v43 = vpack.c.bf16 %v2318_v41, %v2316_v40 }
 0x808   :  { %3450 = vmatpush1.bf16.msra.mxu1 %v3449_v48  ;;  %v2571_v48 = vunpack.c.l.s4 %v3717_v47 }
 0x809   :  { %3452 = vmatprep.subr.bf16.mxu1 %v3451_v49  ;;  %v2573_v49 = vlaneseq }
 0x80a   :  { %v2572_v50 = vunpack.c.0.s8 %v2571_v48 }
 0x80b   :  { %v2574_v51 = vshrl.u32 %v2573_v49, 7 }
 0x80c   :  { %3454 = vmatpush1.bf16.msra.mxu1 %v3453_v54 }
 0x80d   :  { %3456 = vmatprep.subr.bf16.mxu1 %v3455_v55  ;;  %v2575_v53 = vsub.s32 %v2572_v50, %v2574_v51 }
 0x810   :  { %3458 = vmatpush1.bf16.msra.mxu1 %v3457_v60 }
 0x811   :  { %3460 = vmatprep.subr.bf16.mxu1 %v3459_v61 }
 0x814   :  { %3462 = vmatpush1.bf16.msra.mxu1 %v3461_v2 }
 0x815   :  { %3464 = vmatprep.subr.bf16.mxu1 %v3463_v3 }
 0x818   :  { %3466 = vmatpush1.bf16.msra.mxu1 %v3465_v6 }
 0x819   :  { %3468 = vmatprep.subr.bf16.mxu1 %v3467_v9 }
 0x8d2   :  { %v2291_v12 = vpop.f32.mrb[26].mxu1 }
 0x8d3   :  { %v3201_v17 = vpop.f32.mrb[27].mxu1 }
 0x8d6   :  { %v2390_v22 = vpop.f32.mrb[28].mxu1 }
 0x8d7   :  { %2643 = vmatmul.mubr.msk.f32.vlgmr.msra.gmra.mrb[30].mxu1 %vm1082_vm6, %v2390_v22  ;;  %v3206_v14 = vpop.f32.mrb[29].mxu1 }
 0x8d8   :  { %3470 = vmatpush1.bf16.msra.mxu1 %v3469_v18  ;;  %2560 = vmatprep.mubr.f32.mxu1 %v3716_v15  ;;  %v2313_v15 = vld [vmem:[#allocation14 + $0x90] sm:$0xff] }
 0x8d9   :  { %3472 = vmatprep.subr.bf16.mxu1 %v3471_v19  ;;  %v3485_v42 = vpack.c.bf16 %v2313_v15, %v2311_v39 }
 0x8dc   :  { %3474 = vmatpush1.bf16.msra.mxu1 %v3473_v25 }
 0x8dd   :  { %3476 = vmatprep.subr.bf16.mxu1 %v3475_v26 }
 0x8e0   :  { %3478 = vmatpush1.bf16.msra.mxu1 %v3477_v31 }
 0x8e1   :  { %3480 = vmatprep.subr.bf16.mxu1 %v3479_v32 }
 0x8e4   :  { %3482 = vmatpush1.bf16.msra.mxu1 %v3481_v37 }
 0x8e5   :  { %3484 = vmatprep.subr.bf16.mxu1 %v3483_v38 }
 0x8e8   :  { %3486 = vmatpush1.bf16.msra.mxu1 %v3485_v42 }
 0x8e9   :  { %3488 = vmatprep.subr.bf16.mxu1 %v3487_v43 }
 0x8ec   :  { %3490 = vmatpush1.bf16.msra.mxu1 %v3489_v46 }
 0x8ef   :  { %2644 = vmatmul.mubr.msk.f32.vlgmr.msra.gmra.mrb[30].mxu1 %vm1082_vm6, %v2291_v12 }
 0x9c2   :  { %v2562_v52 = vpop.f32.mrb[30].mxu1 }
 0x9c3   :  { %v2564_v54 = vpop.f32.mrb[31].mxu1 }
 0x9c4   :  { %v2569_v55 = vcombine.low %v2562_v52, %v2564_v54 }
 0x9c6   :  { %v2576_v56 = vrot.slane %v2569_v55, %v2575_v53 }
 0x9c8   :  { %2581 = vst.msk [vmem:[#allocation15] sm:$0xf] %vm2580_vm12, %v2576_v56 }
 0x9c9   :  { %3681 = shalt.err (!%p3678_p4)
}
 0x9ca   :  { %s3682_s14 = scalar_lea.hbm %s4109_s12, 64 }
 0x9cb   :  { %p3683_p5 = scmp.ne.s32.totalorder %s4109_s12, %s3682_s14  ;;  %p3686_p6 = scmp.lt.u32.totalorder %s3682_s14, %s4109_s12 }
 0x9cd   :  { %p3688_p7 = pnand %p3686_p6, %p3683_p5 }
 0x9cf   :  { %3691 = shalt.err (!%p3688_p7)
}
 0x9d0   :  { %2591 = dma.vmem_to_hbm [thread:$0]  %s2589_s27, 64, %s4109_s12, [#allocation5]  }
 0x9d1   :  { %3700 = dma.done.wait [#allocation5], 64  }
 0x9d2   :  { %3701 = vsyncadd [#allocation5], 4294967232 }
 0x9d3   :  { %2595 = vsyncpa [#allocation4], 1 }
 0x9d4   :  { %2596 = vsyncpa [#allocation7], 1 }
 0x9d5   :  { %2597 = vsyncpa [#allocation10], 1 }
 0x9d6   :  { %2598 = vsyncpa [#allocation13], 1 }
 0x9d7   :  { %2599 = vsyncpa [#allocation5], 1 }

</bundles_post_ra>
